<compile_context>
chip_gen: v7x
topology: tpu7x:2x2x1
jax: 0.10.0
libtpu: 0.0.40
codegen_flags: <defaults>
</compile_context>

<pallas_src>
import jax
import jax.numpy as jnp
import numpy as np
from jax.experimental import pallas as pl
from jax.experimental.pallas import tpu as pltpu

# Small, self-consistent hyperparameters.
B = 2          # batch
S = 8          # sequence length
E = 32         # embed_dim
H = 32         # hidden_dim   (LSTM hidden; GRU hidden is 2H)
P = 32         # project_dim
C = 6          # number of output classes (OUTPUT_IDS)
IN_VOCAB = 50
OUT_VOCAB = C

H2, H4, H6, H8 = 2 * H, 4 * H, 6 * H, 8 * H
LANES = 8 * H                   # lane width of the packed slabs (= 256)

# Static row offsets inside the packed slabs.
W_IH_BLK_R = 0                  # (2E, 8H) fused bi-LSTM input weights
W_HH_BLK_R = 2 * E              # (2H, 8H) fused bi-LSTM recurrent weights
W_IH_G_R = W_HH_BLK_R + H2      # (E, 6H)  GRU input weights
W_HH_G_R = W_IH_G_R + E         # (2H, 6H) GRU recurrent weights
WSLAB_ROWS = W_HH_G_R + H2      # = 224

B_BLK_R = 0                     # (1, 8H)  fused LSTM biases
B_IH_G_R = 1                    # (1, 6H)
B_HH_G_R = 2                    # (1, 6H)
B_PC_R = 3                      # (1, 2)   folded classifier bias
W_PC_R = 8                      # (2H, 2)  folded project@classify weight
BSLAB_ROWS = W_PC_R + H2        # = 72


# ----------------------------------------------------------------------------
# Pallas kernel
# ----------------------------------------------------------------------------
def bilstm_decoder_kernel(seq_pair_ref, cls_rep_ref, wslab_ref, bslab_ref, out_ref):
    f32, bf16 = jnp.float32, jnp.bfloat16

    # --- unpack the two slabs (static slices, done once) ---------------------
    w_ih_blk = wslab_ref[W_IH_BLK_R:W_IH_BLK_R + 2 * E, :]       # (2E, 8H) bf16
    w_hh_blk = wslab_ref[W_HH_BLK_R:W_HH_BLK_R + H2, :]          # (2H, 8H) bf16
    w_ih_g = wslab_ref[W_IH_G_R:W_IH_G_R + E, 0:H6]              # (E, 6H)  bf16
    w_hh_g = wslab_ref[W_HH_G_R:W_HH_G_R + H2, 0:H6]             # (2H, 6H) bf16

    b_blk = bslab_ref[B_BLK_R:B_BLK_R + 1, :]                    # (1, 8H) f32
    b_ih_g = bslab_ref[B_IH_G_R:B_IH_G_R + 1, 0:H6]              # (1, 6H)
    b_hh_g = bslab_ref[B_HH_G_R:B_HH_G_R + 1, 0:H6]              # (1, 6H)
    b_pc = bslab_ref[B_PC_R:B_PC_R + 1, 0:2]                     # (1, 2)
    w_pc = bslab_ref[W_PC_R:W_PC_R + H2, 0:2]                    # (2H, 2) f32

    # --- Bi-LSTM encoder ------------------------------------------------------
    # Input projection for all S timesteps and BOTH directions in one matmul,
    # bias (gate-interleaved) folded in.  Off the serial chain.
    x_pair = jnp.tanh(seq_pair_ref[...])                          # (S*B, 2E) f32
    xg = jnp.dot(x_pair.astype(bf16), w_ih_blk,
                 preferred_element_type=f32) + b_blk              # (S*B, 8H) f32

    # Hidden / cell state carry both directions side by side: [fwd | bwd].
    h = jnp.zeros((B, H2), f32)
    cell = jnp.zeros((B, H2), f32)
    for i in range(S):
        # exactly one (B,2H)x(2H,8H) matmul per step on the dependent chain
        gates = xg[i * B:(i + 1) * B, :] + jnp.dot(
            h.astype(bf16), w_hh_blk, preferred_element_type=f32)  # (B, 8H)
        # whole-vreg sigmoid (EUP); columns are [i_f,i_b, f_f,f_b, g_f,g_b, o_f,o_b]
        sg = jax.nn.sigmoid(gates)
        ig = sg[:, 0:H2]
        fg = sg[:, H2:H4]
        og = sg[:, H6:H8]
        gg = jnp.tanh(gates[:, H4:H6])
        cell = fg * cell + ig * gg
        h = og * jnp.tanh(cell)
    # h == cat([fh, bh], dim=-1) by construction of the interleaved layout.

    # --- GRU decoder over classes --------------------------------------------
    # Class-invariant input projection hoisted out of the loop (bias folded in).
    gi_all = jnp.dot(jnp.tanh(cls_rep_ref[...]).astype(bf16), w_ih_g,
                     preferred_element_type=f32) + b_ih_g          # (C*B, 6H)
    b_hh_gb = jnp.broadcast_to(b_hh_g, (B, H6))                    # hoisted broadcast

    hs = []
    for k in range(C):
        gi = gi_all[k * B:(k + 1) * B, :]                          # (B, 6H)
        gh = jnp.dot(h.astype(bf16), w_hh_g,
                     preferred_element_type=f32) + b_hh_gb         # (B, 6H)
        rz = jax.nn.sigmoid(gi[:, 0:H4] + gh[:, 0:H4])
        r = rz[:, 0:H2]
        z = rz[:, H2:H4]
        n = jnp.tanh(gi[:, H4:H6] + r * gh[:, H4:H6])
        h = jnp.tanh((1.0 - z) * n + z * h)                        # (B, 2H)
        hs.append(h)

    # --- folded project+classify + log_softmax, single output store ----------
    hs_all = jnp.concatenate(hs, axis=0)                           # (C*B, 2H)
    logits = jnp.dot(hs_all, w_pc, preferred_element_type=f32) + b_pc   # (C*B, 2)
    m = jnp.max(logits, axis=-1, keepdims=True)
    shifted = logits - m
    lse = jnp.log(jnp.sum(jnp.exp(shifted), axis=-1, keepdims=True))
    out_ref[...] = shifted - lse


# ----------------------------------------------------------------------------
# Weight packing (wrapper-side, plain XLA — done once)
# ----------------------------------------------------------------------------
def _fwd_cols(w):
    """Place torch-order gate columns (i,f,g,o) of the FORWARD cell into the even
    H-wide blocks of an 8H-wide, gate-interleaved layout; zeros elsewhere."""
    k = w.shape[0]
    z = jnp.zeros((k, 4, H), jnp.float32)
    return jnp.stack([w.reshape(k, 4, H), z], axis=2).reshape(k, H8)


def _bwd_cols(w):
    k = w.shape[0]
    z = jnp.zeros((k, 4, H), jnp.float32)
    return jnp.stack([z, w.reshape(k, 4, H)], axis=2).reshape(k, H8)


def _pad_lanes(a, n=LANES):
    return jnp.pad(a, ((0, 0), (0, n - a.shape[1])))


def pack_slabs(params):
    """Pack the 14 weight/bias tensors into 2 contiguous slabs (4 kernel inputs)."""
    # Fused bi-LSTM weights: rows = [fwd in/hidden ; bwd in/hidden], columns
    # interleaved per gate: [i_f, i_b, f_f, f_b, g_f, g_b, o_f, o_b].
    w_ih_blk = jnp.concatenate([_fwd_cols(params["w_ih_f"]),
                                _bwd_cols(params["w_ih_b"])], axis=0)   # (2E, 8H)
    w_hh_blk = jnp.concatenate([_fwd_cols(params["w_hh_f"]),
                                _bwd_cols(params["w_hh_b"])], axis=0)   # (2H, 8H)
    b_blk = jnp.stack([params["b_f"].reshape(1, 4, H),
                       params["b_b"].reshape(1, 4, H)], axis=2).reshape(1, H8)

    wslab = jnp.concatenate([
        w_ih_blk,                               # rows   0: 64
        w_hh_blk,                               # rows  64:128
        _pad_lanes(params["w_ih_g"]),           # rows 128:160
        _pad_lanes(params["w_hh_g"]),           # rows 160:224
    ], axis=0).astype(jnp.bfloat16)             # (224, 256) bf16

    # project+classify folded (no nonlinearity between them -> exact).
    w_pc = jnp.dot(params["w_p"], params["w_c"])                    # (2H, 2)
    b_pc = jnp.dot(params["b_p"], params["w_c"]) + params["b_c"]    # (1, 2)

    bslab = jnp.concatenate([
        b_blk,                                  # row 0
        _pad_lanes(params["b_ih_g"]),           # row 1
        _pad_lanes(params["b_hh_g"]),           # row 2
        _pad_lanes(b_pc),                       # row 3
        jnp.zeros((4, LANES), jnp.float32),     # rows 4:8 (pad)
        _pad_lanes(w_pc),                       # rows 8:72
    ], axis=0)                                  # (72, 256) f32
    return wslab, bslab


# ----------------------------------------------------------------------------
# Forward wrapper
# ----------------------------------------------------------------------------
def bilstm_decoder_forward(seq_ids, class_ids, params):
    # Glue (no clean Pallas equivalent): embedding gathers + static reordering.
    seq_emb = jnp.take(params["embed"], seq_ids, axis=0)                  # (B, S, E)
    seq_emb = jnp.transpose(seq_emb, (1, 0, 2)).astype(jnp.float32)       # (S, B, E)
    rev = (-np.arange(S)) % S    # torch `seq_emb[-i]` indices: [0, S-1, ..., 1]
    seq_pair = jnp.concatenate([seq_emb, seq_emb[rev]], axis=-1)          # (S, B, 2E)
    seq_pair = seq_pair.reshape(S * B, 2 * E)

    cls_emb = jnp.take(params["embed_class"], class_ids, axis=0)          # (C, E)
    cls_rep = jnp.broadcast_to(cls_emb[:, None, :].astype(jnp.float32),
                               (C, B, E)).reshape(C * B, E)               # (C*B, E)

    wslab, bslab = pack_slabs(params)

    vmem = lambda: pl.BlockSpec(memory_space=pltpu.MemorySpace.VMEM)
    out = pl.pallas_call(
        bilstm_decoder_kernel,
        out_shape=jax.ShapeDtypeStruct((C * B, 2), jnp.float32),
        in_specs=[vmem(), vmem(), vmem(), vmem()],
        out_specs=vmem(),
    )(seq_pair, cls_rep, wslab, bslab)
    return out.reshape(C, B, 2)


# ----------------------------------------------------------------------------
# Pure-JAX reference (f32 throughout) for correctness checking
# ----------------------------------------------------------------------------
def _lstm_step(x, h, c, w_ih, w_hh, b):
    gates = (jnp.dot(x, w_ih, preferred_element_type=jnp.float32)
             + jnp.dot(h, w_hh, preferred_element_type=jnp.float32) + b)
    i = jax.nn.sigmoid(gates[:, 0 * H:1 * H])
    f = jax.nn.sigmoid(gates[:, 1 * H:2 * H])
    g = jnp.tanh(gates[:, 2 * H:3 * H])
    o = jax.nn.sigmoid(gates[:, 3 * H:4 * H])
    c_new = f * c + i * g
    h_new = o * jnp.tanh(c_new)
    return h_new, c_new


def _gru_step(x, h, w_ih, w_hh, b_ih, b_hh):
    gi = jnp.dot(x, w_ih, preferred_element_type=jnp.float32) + b_ih
    gh = jnp.dot(h, w_hh, preferred_element_type=jnp.float32) + b_hh
    r = jax.nn.sigmoid(gi[:, 0:H2] + gh[:, 0:H2])
    z = jax.nn.sigmoid(gi[:, H2:H4] + gh[:, H2:H4])
    n = jnp.tanh(gi[:, H4:H6] + r * gh[:, H4:H6])
    return (1.0 - z) * n + z * h


def reference_forward(seq_ids, class_ids, params):
    seq_emb = jnp.tanh(jnp.transpose(jnp.take(params["embed"], seq_ids, axis=0), (1, 0, 2)))
    cls_emb = jnp.tanh(jnp.take(params["embed_class"], class_ids, axis=0))
    zeros = jnp.zeros((B, H), jnp.float32)
    fh, fcell = zeros, zeros
    bh, bcell = zeros, zeros
    for i in range(S):
        fh, fcell = _lstm_step(seq_emb[i], fh, fcell,
                               params["w_ih_f"], params["w_hh_f"], params["b_f"])
        bh, bcell = _lstm_step(seq_emb[(-i) % S], bh, bcell,
                               params["w_ih_b"], params["w_hh_b"], params["b_b"])
    h = jnp.concatenate([fh, bh], axis=-1)
    outs = []
    for c in range(C):
        ce = jnp.broadcast_to(cls_emb[c:c + 1, :], (B, E))
        h = jnp.tanh(_gru_step(ce, h, params["w_ih_g"], params["w_hh_g"],
                               params["b_ih_g"], params["b_hh_g"]))
        proj = jnp.dot(h, params["w_p"]) + params["b_p"]
        logits = jnp.dot(proj, params["w_c"]) + params["b_c"]
        outs.append(jax.nn.log_softmax(logits, axis=-1))
    return jnp.stack(outs)


def init_params(key):
    ks = jax.random.split(key, 18)

    def u(k, shape, scale):
        return jax.random.uniform(k, shape, jnp.float32, -scale, scale)

    sH = 1.0 / np.sqrt(H)
    s2H = 1.0 / np.sqrt(2 * H)
    sP = 1.0 / np.sqrt(P)
    return dict(
        embed=jax.random.normal(ks[0], (IN_VOCAB, E), jnp.float32),
        embed_class=jax.random.normal(ks[1], (OUT_VOCAB, E), jnp.float32),
        # forward LSTMCell (weights transposed to (in, 4H); biases summed: b_ih + b_hh)
        w_ih_f=u(ks[2], (E, 4 * H), sH),
        w_hh_f=u(ks[3], (H, 4 * H), sH),
        b_f=u(ks[4], (1, 4 * H), sH) + u(ks[5], (1, 4 * H), sH),
        # backward LSTMCell
        w_ih_b=u(ks[6], (E, 4 * H), sH),
        w_hh_b=u(ks[7], (H, 4 * H), sH),
        b_b=u(ks[8], (1, 4 * H), sH) + u(ks[9], (1, 4 * H), sH),
        # GRUCell decoder (hidden size 2H); biases stay separate (n-gate uses r*(Wh h + b_hh))
        w_ih_g=u(ks[10], (E, 6 * H), s2H),
        w_hh_g=u(ks[11], (2 * H, 6 * H), s2H),
        b_ih_g=u(ks[12], (1, 6 * H), s2H),
        b_hh_g=u(ks[13], (1, 6 * H), s2H),
        # project (2H -> P) and classify (P -> 2)
        w_p=u(ks[14], (2 * H, P), s2H),
        b_p=u(ks[15], (1, P), s2H),
        w_c=u(ks[16], (P, 2), sP),
        b_c=u(ks[17], (1, 2), sP),
    )


if __name__ == "__main__":
    key = jax.random.PRNGKey(0)
    k_param, k_seq = jax.random.split(key)
    params = init_params(k_param)
    seq_ids = jax.random.randint(k_seq, (B, S), 0, IN_VOCAB, dtype=jnp.int32)
    class_ids = jnp.arange(C, dtype=jnp.int32)   # OUTPUT_IDS

    out = bilstm_decoder_forward(seq_ids, class_ids, params)
    out = jax.block_until_ready(out)

    assert out.shape == (C, B, 2), out.shape
    ref = reference_forward(seq_ids, class_ids, params)
    np.testing.assert_allclose(np.asarray(out), np.asarray(ref), atol=2e-2, rtol=2e-2)

    print("KERNEL_OK")
</pallas_src>

<mosaic_0001>
module attributes {stable_mosaic.version = 11 : i64} {
  func.func @bilstm_decoder_kernel(%arg0: memref<16x64xf32, #tpu.memory_space<vmem>>, %arg1: memref<12x32xf32, #tpu.memory_space<vmem>>, %arg2: memref<224x256xbf16, #tpu.memory_space<vmem>>, %arg3: memref<72x256xf32, #tpu.memory_space<vmem>>, %arg4: memref<12x2xf32, #tpu.memory_space<vmem>>) attributes {dimension_semantics = [], scalar_prefetch = 0 : i64, scratch_operands = 0 : i64, tpu.core_type = #tpu.core_type<tc>} {
    %c0 = arith.constant 0 : index
    %c0_0 = arith.constant 0 : index
    %0 = vector.load %arg2[%c0, %c0_0] : memref<224x256xbf16, #tpu.memory_space<vmem>>, vector<64x256xbf16>
    %c64 = arith.constant 64 : index
    %c0_1 = arith.constant 0 : index
    %1 = vector.load %arg2[%c64, %c0_1] : memref<224x256xbf16, #tpu.memory_space<vmem>>, vector<64x256xbf16>
    %c128 = arith.constant 128 : index
    %c0_2 = arith.constant 0 : index
    %2 = vector.load %arg2[%c128, %c0_2] : memref<224x256xbf16, #tpu.memory_space<vmem>>, vector<32x192xbf16>
    %c160 = arith.constant 160 : index
    %c0_3 = arith.constant 0 : index
    %3 = vector.load %arg2[%c160, %c0_3] : memref<224x256xbf16, #tpu.memory_space<vmem>>, vector<64x192xbf16>
    %c0_4 = arith.constant 0 : index
    %c0_5 = arith.constant 0 : index
    %4 = vector.load %arg3[%c0_4, %c0_5] : memref<72x256xf32, #tpu.memory_space<vmem>>, vector<1x256xf32>
    %c1 = arith.constant 1 : index
    %c0_6 = arith.constant 0 : index
    %5 = vector.load %arg3[%c1, %c0_6] : memref<72x256xf32, #tpu.memory_space<vmem>>, vector<1x192xf32>
    %c2 = arith.constant 2 : index
    %c0_7 = arith.constant 0 : index
    %6 = vector.load %arg3[%c2, %c0_7] : memref<72x256xf32, #tpu.memory_space<vmem>>, vector<1x192xf32>
    %c3 = arith.constant 3 : index
    %c0_8 = arith.constant 0 : index
    %7 = vector.load %arg3[%c3, %c0_8] : memref<72x256xf32, #tpu.memory_space<vmem>>, vector<1x2xf32>
    %c8 = arith.constant 8 : index
    %c0_9 = arith.constant 0 : index
    %8 = vector.load %arg3[%c8, %c0_9] : memref<72x256xf32, #tpu.memory_space<vmem>>, vector<64x2xf32>
    %c0_10 = arith.constant 0 : index
    %c0_11 = arith.constant 0 : index
    %9 = vector.load %arg0[%c0_10, %c0_11] : memref<16x64xf32, #tpu.memory_space<vmem>>, vector<16x64xf32>
    %10 = math.tanh %9 : vector<16x64xf32>
    %11 = arith.truncf %10 : vector<16x64xf32> to vector<16x64xbf16>
    %cst = arith.constant dense<0.000000e+00> : vector<16x256xf32>
    %12 = tpu.matmul %11, %0, %cst {dimension_numbers = #tpu.dot_dimension_numbers<[1], [0], [0], [1], [0, 0, 1, 1], [], []>} : vector<16x64xbf16>, vector<64x256xbf16>, vector<16x256xf32> -> vector<16x256xf32>
    %13 = vector.broadcast %4 : vector<1x256xf32> to vector<16x256xf32>
    %14 = arith.addf %12, %13 : vector<16x256xf32>
    %cst_12 = arith.constant 0.000000e+00 : f32
    %15 = vector.broadcast %cst_12 : f32 to vector<2x64xf32>
    %cst_13 = arith.constant 0.000000e+00 : f32
    %16 = vector.broadcast %cst_13 : f32 to vector<2x64xf32>
    %17 = vector.extract_strided_slice %14 {offsets = [0, 0], sizes = [2, 256], strides = [1, 1]} : vector<16x256xf32> to vector<2x256xf32>
    %18 = arith.truncf %15 : vector<2x64xf32> to vector<2x64xbf16>
    %cst_14 = arith.constant dense<0.000000e+00> : vector<2x256xf32>
    %19 = tpu.matmul %18, %1, %cst_14 {dimension_numbers = #tpu.dot_dimension_numbers<[1], [0], [0], [1], [0, 0, 1, 1], [], []>} : vector<2x64xbf16>, vector<64x256xbf16>, vector<2x256xf32> -> vector<2x256xf32>
    %20 = arith.addf %17, %19 : vector<2x256xf32>
    %21 = arith.negf %20 : vector<2x256xf32>
    %22 = math.exp %21 : vector<2x256xf32>
    %cst_15 = arith.constant 1.000000e+00 : f32
    %23 = vector.broadcast %cst_15 : f32 to vector<2x256xf32>
    %24 = arith.addf %23, %22 : vector<2x256xf32>
    %25 = arith.divf %23, %24 : vector<2x256xf32>
    %26 = vector.extract_strided_slice %25 {offsets = [0, 0], sizes = [2, 64], strides = [1, 1]} : vector<2x256xf32> to vector<2x64xf32>
    %27 = vector.extract_strided_slice %25 {offsets = [0, 64], sizes = [2, 64], strides = [1, 1]} : vector<2x256xf32> to vector<2x64xf32>
    %28 = vector.extract_strided_slice %25 {offsets = [0, 192], sizes = [2, 64], strides = [1, 1]} : vector<2x256xf32> to vector<2x64xf32>
    %29 = vector.extract_strided_slice %20 {offsets = [0, 128], sizes = [2, 64], strides = [1, 1]} : vector<2x256xf32> to vector<2x64xf32>
    %30 = math.tanh %29 : vector<2x64xf32>
    %31 = arith.mulf %27, %16 : vector<2x64xf32>
    %32 = arith.mulf %26, %30 : vector<2x64xf32>
    %33 = arith.addf %31, %32 : vector<2x64xf32>
    %34 = math.tanh %33 : vector<2x64xf32>
    %35 = arith.mulf %28, %34 : vector<2x64xf32>
    %36 = vector.extract_strided_slice %14 {offsets = [2, 0], sizes = [2, 256], strides = [1, 1]} : vector<16x256xf32> to vector<2x256xf32>
    %37 = arith.truncf %35 : vector<2x64xf32> to vector<2x64xbf16>
    %cst_16 = arith.constant dense<0.000000e+00> : vector<2x256xf32>
    %38 = tpu.matmul %37, %1, %cst_16 {dimension_numbers = #tpu.dot_dimension_numbers<[1], [0], [0], [1], [0, 0, 1, 1], [], []>} : vector<2x64xbf16>, vector<64x256xbf16>, vector<2x256xf32> -> vector<2x256xf32>
    %39 = arith.addf %36, %38 : vector<2x256xf32>
    %40 = arith.negf %39 : vector<2x256xf32>
    %41 = math.exp %40 : vector<2x256xf32>
    %cst_17 = arith.constant 1.000000e+00 : f32
    %42 = vector.broadcast %cst_17 : f32 to vector<2x256xf32>
    %43 = arith.addf %42, %41 : vector<2x256xf32>
    %44 = arith.divf %42, %43 : vector<2x256xf32>
    %45 = vector.extract_strided_slice %44 {offsets = [0, 0], sizes = [2, 64], strides = [1, 1]} : vector<2x256xf32> to vector<2x64xf32>
    %46 = vector.extract_strided_slice %44 {offsets = [0, 64], sizes = [2, 64], strides = [1, 1]} : vector<2x256xf32> to vector<2x64xf32>
    %47 = vector.extract_strided_slice %44 {offsets = [0, 192], sizes = [2, 64], strides = [1, 1]} : vector<2x256xf32> to vector<2x64xf32>
    %48 = vector.extract_strided_slice %39 {offsets = [0, 128], sizes = [2, 64], strides = [1, 1]} : vector<2x256xf32> to vector<2x64xf32>
    %49 = math.tanh %48 : vector<2x64xf32>
    %50 = arith.mulf %46, %33 : vector<2x64xf32>
    %51 = arith.mulf %45, %49 : vector<2x64xf32>
    %52 = arith.addf %50, %51 : vector<2x64xf32>
    %53 = math.tanh %52 : vector<2x64xf32>
    %54 = arith.mulf %47, %53 : vector<2x64xf32>
    %55 = vector.extract_strided_slice %14 {offsets = [4, 0], sizes = [2, 256], strides = [1, 1]} : vector<16x256xf32> to vector<2x256xf32>
    %56 = arith.truncf %54 : vector<2x64xf32> to vector<2x64xbf16>
    %cst_18 = arith.constant dense<0.000000e+00> : vector<2x256xf32>
    %57 = tpu.matmul %56, %1, %cst_18 {dimension_numbers = #tpu.dot_dimension_numbers<[1], [0], [0], [1], [0, 0, 1, 1], [], []>} : vector<2x64xbf16>, vector<64x256xbf16>, vector<2x256xf32> -> vector<2x256xf32>
    %58 = arith.addf %55, %57 : vector<2x256xf32>
    %59 = arith.negf %58 : vector<2x256xf32>
    %60 = math.exp %59 : vector<2x256xf32>
    %cst_19 = arith.constant 1.000000e+00 : f32
    %61 = vector.broadcast %cst_19 : f32 to vector<2x256xf32>
    %62 = arith.addf %61, %60 : vector<2x256xf32>
    %63 = arith.divf %61, %62 : vector<2x256xf32>
    %64 = vector.extract_strided_slice %63 {offsets = [0, 0], sizes = [2, 64], strides = [1, 1]} : vector<2x256xf32> to vector<2x64xf32>
    %65 = vector.extract_strided_slice %63 {offsets = [0, 64], sizes = [2, 64], strides = [1, 1]} : vector<2x256xf32> to vector<2x64xf32>
    %66 = vector.extract_strided_slice %63 {offsets = [0, 192], sizes = [2, 64], strides = [1, 1]} : vector<2x256xf32> to vector<2x64xf32>
    %67 = vector.extract_strided_slice %58 {offsets = [0, 128], sizes = [2, 64], strides = [1, 1]} : vector<2x256xf32> to vector<2x64xf32>
    %68 = math.tanh %67 : vector<2x64xf32>
    %69 = arith.mulf %65, %52 : vector<2x64xf32>
    %70 = arith.mulf %64, %68 : vector<2x64xf32>
    %71 = arith.addf %69, %70 : vector<2x64xf32>
    %72 = math.tanh %71 : vector<2x64xf32>
    %73 = arith.mulf %66, %72 : vector<2x64xf32>
    %74 = vector.extract_strided_slice %14 {offsets = [6, 0], sizes = [2, 256], strides = [1, 1]} : vector<16x256xf32> to vector<2x256xf32>
    %75 = arith.truncf %73 : vector<2x64xf32> to vector<2x64xbf16>
    %cst_20 = arith.constant dense<0.000000e+00> : vector<2x256xf32>
    %76 = tpu.matmul %75, %1, %cst_20 {dimension_numbers = #tpu.dot_dimension_numbers<[1], [0], [0], [1], [0, 0, 1, 1], [], []>} : vector<2x64xbf16>, vector<64x256xbf16>, vector<2x256xf32> -> vector<2x256xf32>
    %77 = arith.addf %74, %76 : vector<2x256xf32>
    %78 = arith.negf %77 : vector<2x256xf32>
    %79 = math.exp %78 : vector<2x256xf32>
    %cst_21 = arith.constant 1.000000e+00 : f32
    %80 = vector.broadcast %cst_21 : f32 to vector<2x256xf32>
    %81 = arith.addf %80, %79 : vector<2x256xf32>
    %82 = arith.divf %80, %81 : vector<2x256xf32>
    %83 = vector.extract_strided_slice %82 {offsets = [0, 0], sizes = [2, 64], strides = [1, 1]} : vector<2x256xf32> to vector<2x64xf32>
    %84 = vector.extract_strided_slice %82 {offsets = [0, 64], sizes = [2, 64], strides = [1, 1]} : vector<2x256xf32> to vector<2x64xf32>
    %85 = vector.extract_strided_slice %82 {offsets = [0, 192], sizes = [2, 64], strides = [1, 1]} : vector<2x256xf32> to vector<2x64xf32>
    %86 = vector.extract_strided_slice %77 {offsets = [0, 128], sizes = [2, 64], strides = [1, 1]} : vector<2x256xf32> to vector<2x64xf32>
    %87 = math.tanh %86 : vector<2x64xf32>
    %88 = arith.mulf %84, %71 : vector<2x64xf32>
    %89 = arith.mulf %83, %87 : vector<2x64xf32>
    %90 = arith.addf %88, %89 : vector<2x64xf32>
    %91 = math.tanh %90 : vector<2x64xf32>
    %92 = arith.mulf %85, %91 : vector<2x64xf32>
    %93 = vector.extract_strided_slice %14 {offsets = [8, 0], sizes = [2, 256], strides = [1, 1]} : vector<16x256xf32> to vector<2x256xf32>
    %94 = arith.truncf %92 : vector<2x64xf32> to vector<2x64xbf16>
    %cst_22 = arith.constant dense<0.000000e+00> : vector<2x256xf32>
    %95 = tpu.matmul %94, %1, %cst_22 {dimension_numbers = #tpu.dot_dimension_numbers<[1], [0], [0], [1], [0, 0, 1, 1], [], []>} : vector<2x64xbf16>, vector<64x256xbf16>, vector<2x256xf32> -> vector<2x256xf32>
    %96 = arith.addf %93, %95 : vector<2x256xf32>
    %97 = arith.negf %96 : vector<2x256xf32>
    %98 = math.exp %97 : vector<2x256xf32>
    %cst_23 = arith.constant 1.000000e+00 : f32
    %99 = vector.broadcast %cst_23 : f32 to vector<2x256xf32>
    %100 = arith.addf %99, %98 : vector<2x256xf32>
    %101 = arith.divf %99, %100 : vector<2x256xf32>
    %102 = vector.extract_strided_slice %101 {offsets = [0, 0], sizes = [2, 64], strides = [1, 1]} : vector<2x256xf32> to vector<2x64xf32>
    %103 = vector.extract_strided_slice %101 {offsets = [0, 64], sizes = [2, 64], strides = [1, 1]} : vector<2x256xf32> to vector<2x64xf32>
    %104 = vector.extract_strided_slice %101 {offsets = [0, 192], sizes = [2, 64], strides = [1, 1]} : vector<2x256xf32> to vector<2x64xf32>
    %105 = vector.extract_strided_slice %96 {offsets = [0, 128], sizes = [2, 64], strides = [1, 1]} : vector<2x256xf32> to vector<2x64xf32>
    %106 = math.tanh %105 : vector<2x64xf32>
    %107 = arith.mulf %103, %90 : vector<2x64xf32>
    %108 = arith.mulf %102, %106 : vector<2x64xf32>
    %109 = arith.addf %107, %108 : vector<2x64xf32>
    %110 = math.tanh %109 : vector<2x64xf32>
    %111 = arith.mulf %104, %110 : vector<2x64xf32>
    %112 = vector.extract_strided_slice %14 {offsets = [10, 0], sizes = [2, 256], strides = [1, 1]} : vector<16x256xf32> to vector<2x256xf32>
    %113 = arith.truncf %111 : vector<2x64xf32> to vector<2x64xbf16>
    %cst_24 = arith.constant dense<0.000000e+00> : vector<2x256xf32>
    %114 = tpu.matmul %113, %1, %cst_24 {dimension_numbers = #tpu.dot_dimension_numbers<[1], [0], [0], [1], [0, 0, 1, 1], [], []>} : vector<2x64xbf16>, vector<64x256xbf16>, vector<2x256xf32> -> vector<2x256xf32>
    %115 = arith.addf %112, %114 : vector<2x256xf32>
    %116 = arith.negf %115 : vector<2x256xf32>
    %117 = math.exp %116 : vector<2x256xf32>
    %cst_25 = arith.constant 1.000000e+00 : f32
    %118 = vector.broadcast %cst_25 : f32 to vector<2x256xf32>
    %119 = arith.addf %118, %117 : vector<2x256xf32>
    %120 = arith.divf %118, %119 : vector<2x256xf32>
    %121 = vector.extract_strided_slice %120 {offsets = [0, 0], sizes = [2, 64], strides = [1, 1]} : vector<2x256xf32> to vector<2x64xf32>
    %122 = vector.extract_strided_slice %120 {offsets = [0, 64], sizes = [2, 64], strides = [1, 1]} : vector<2x256xf32> to vector<2x64xf32>
    %123 = vector.extract_strided_slice %120 {offsets = [0, 192], sizes = [2, 64], strides = [1, 1]} : vector<2x256xf32> to vector<2x64xf32>
    %124 = vector.extract_strided_slice %115 {offsets = [0, 128], sizes = [2, 64], strides = [1, 1]} : vector<2x256xf32> to vector<2x64xf32>
    %125 = math.tanh %124 : vector<2x64xf32>
    %126 = arith.mulf %122, %109 : vector<2x64xf32>
    %127 = arith.mulf %121, %125 : vector<2x64xf32>
    %128 = arith.addf %126, %127 : vector<2x64xf32>
    %129 = math.tanh %128 : vector<2x64xf32>
    %130 = arith.mulf %123, %129 : vector<2x64xf32>
    %131 = vector.extract_strided_slice %14 {offsets = [12, 0], sizes = [2, 256], strides = [1, 1]} : vector<16x256xf32> to vector<2x256xf32>
    %132 = arith.truncf %130 : vector<2x64xf32> to vector<2x64xbf16>
    %cst_26 = arith.constant dense<0.000000e+00> : vector<2x256xf32>
    %133 = tpu.matmul %132, %1, %cst_26 {dimension_numbers = #tpu.dot_dimension_numbers<[1], [0], [0], [1], [0, 0, 1, 1], [], []>} : vector<2x64xbf16>, vector<64x256xbf16>, vector<2x256xf32> -> vector<2x256xf32>
    %134 = arith.addf %131, %133 : vector<2x256xf32>
    %135 = arith.negf %134 : vector<2x256xf32>
    %136 = math.exp %135 : vector<2x256xf32>
    %cst_27 = arith.constant 1.000000e+00 : f32
    %137 = vector.broadcast %cst_27 : f32 to vector<2x256xf32>
    %138 = arith.addf %137, %136 : vector<2x256xf32>
    %139 = arith.divf %137, %138 : vector<2x256xf32>
    %140 = vector.extract_strided_slice %139 {offsets = [0, 0], sizes = [2, 64], strides = [1, 1]} : vector<2x256xf32> to vector<2x64xf32>
    %141 = vector.extract_strided_slice %139 {offsets = [0, 64], sizes = [2, 64], strides = [1, 1]} : vector<2x256xf32> to vector<2x64xf32>
    %142 = vector.extract_strided_slice %139 {offsets = [0, 192], sizes = [2, 64], strides = [1, 1]} : vector<2x256xf32> to vector<2x64xf32>
    %143 = vector.extract_strided_slice %134 {offsets = [0, 128], sizes = [2, 64], strides = [1, 1]} : vector<2x256xf32> to vector<2x64xf32>
    %144 = math.tanh %143 : vector<2x64xf32>
    %145 = arith.mulf %141, %128 : vector<2x64xf32>
    %146 = arith.mulf %140, %144 : vector<2x64xf32>
    %147 = arith.addf %145, %146 : vector<2x64xf32>
    %148 = math.tanh %147 : vector<2x64xf32>
    %149 = arith.mulf %142, %148 : vector<2x64xf32>
    %150 = vector.extract_strided_slice %14 {offsets = [14, 0], sizes = [2, 256], strides = [1, 1]} : vector<16x256xf32> to vector<2x256xf32>
    %151 = arith.truncf %149 : vector<2x64xf32> to vector<2x64xbf16>
    %cst_28 = arith.constant dense<0.000000e+00> : vector<2x256xf32>
    %152 = tpu.matmul %151, %1, %cst_28 {dimension_numbers = #tpu.dot_dimension_numbers<[1], [0], [0], [1], [0, 0, 1, 1], [], []>} : vector<2x64xbf16>, vector<64x256xbf16>, vector<2x256xf32> -> vector<2x256xf32>
    %153 = arith.addf %150, %152 : vector<2x256xf32>
    %154 = arith.negf %153 : vector<2x256xf32>
    %155 = math.exp %154 : vector<2x256xf32>
    %cst_29 = arith.constant 1.000000e+00 : f32
    %156 = vector.broadcast %cst_29 : f32 to vector<2x256xf32>
    %157 = arith.addf %156, %155 : vector<2x256xf32>
    %158 = arith.divf %156, %157 : vector<2x256xf32>
    %159 = vector.extract_strided_slice %158 {offsets = [0, 0], sizes = [2, 64], strides = [1, 1]} : vector<2x256xf32> to vector<2x64xf32>
    %160 = vector.extract_strided_slice %158 {offsets = [0, 64], sizes = [2, 64], strides = [1, 1]} : vector<2x256xf32> to vector<2x64xf32>
    %161 = vector.extract_strided_slice %158 {offsets = [0, 192], sizes = [2, 64], strides = [1, 1]} : vector<2x256xf32> to vector<2x64xf32>
    %162 = vector.extract_strided_slice %153 {offsets = [0, 128], sizes = [2, 64], strides = [1, 1]} : vector<2x256xf32> to vector<2x64xf32>
    %163 = math.tanh %162 : vector<2x64xf32>
    %164 = arith.mulf %160, %147 : vector<2x64xf32>
    %165 = arith.mulf %159, %163 : vector<2x64xf32>
    %166 = arith.addf %164, %165 : vector<2x64xf32>
    %167 = math.tanh %166 : vector<2x64xf32>
    %168 = arith.mulf %161, %167 : vector<2x64xf32>
    %c0_30 = arith.constant 0 : index
    %c0_31 = arith.constant 0 : index
    %169 = vector.load %arg1[%c0_30, %c0_31] : memref<12x32xf32, #tpu.memory_space<vmem>>, vector<12x32xf32>
    %170 = math.tanh %169 : vector<12x32xf32>
    %171 = arith.truncf %170 : vector<12x32xf32> to vector<12x32xbf16>
    %cst_32 = arith.constant dense<0.000000e+00> : vector<12x192xf32>
    %172 = tpu.matmul %171, %2, %cst_32 {dimension_numbers = #tpu.dot_dimension_numbers<[1], [0], [0], [1], [0, 0, 1, 1], [], []>} : vector<12x32xbf16>, vector<32x192xbf16>, vector<12x192xf32> -> vector<12x192xf32>
    %173 = vector.broadcast %5 : vector<1x192xf32> to vector<12x192xf32>
    %174 = arith.addf %172, %173 : vector<12x192xf32>
    %175 = vector.shape_cast %6 : vector<1x192xf32> to vector<1x192xf32>
    %176 = vector.broadcast %175 : vector<1x192xf32> to vector<2x192xf32>
    %177 = vector.extract_strided_slice %174 {offsets = [0, 0], sizes = [2, 192], strides = [1, 1]} : vector<12x192xf32> to vector<2x192xf32>
    %178 = arith.truncf %168 : vector<2x64xf32> to vector<2x64xbf16>
    %cst_33 = arith.constant dense<0.000000e+00> : vector<2x192xf32>
    %179 = tpu.matmul %178, %3, %cst_33 {dimension_numbers = #tpu.dot_dimension_numbers<[1], [0], [0], [1], [0, 0, 1, 1], [], []>} : vector<2x64xbf16>, vector<64x192xbf16>, vector<2x192xf32> -> vector<2x192xf32>
    %180 = arith.addf %179, %176 : vector<2x192xf32>
    %181 = vector.extract_strided_slice %177 {offsets = [0, 0], sizes = [2, 128], strides = [1, 1]} : vector<2x192xf32> to vector<2x128xf32>
    %182 = vector.extract_strided_slice %180 {offsets = [0, 0], sizes = [2, 128], strides = [1, 1]} : vector<2x192xf32> to vector<2x128xf32>
    %183 = arith.addf %181, %182 : vector<2x128xf32>
    %184 = arith.negf %183 : vector<2x128xf32>
    %185 = math.exp %184 : vector<2x128xf32>
    %cst_34 = arith.constant 1.000000e+00 : f32
    %186 = vector.broadcast %cst_34 : f32 to vector<2x128xf32>
    %187 = arith.addf %186, %185 : vector<2x128xf32>
    %188 = arith.divf %186, %187 : vector<2x128xf32>
    %189 = vector.extract_strided_slice %188 {offsets = [0, 0], sizes = [2, 64], strides = [1, 1]} : vector<2x128xf32> to vector<2x64xf32>
    %190 = vector.extract_strided_slice %188 {offsets = [0, 64], sizes = [2, 64], strides = [1, 1]} : vector<2x128xf32> to vector<2x64xf32>
    %191 = vector.extract_strided_slice %177 {offsets = [0, 128], sizes = [2, 64], strides = [1, 1]} : vector<2x192xf32> to vector<2x64xf32>
    %192 = vector.extract_strided_slice %180 {offsets = [0, 128], sizes = [2, 64], strides = [1, 1]} : vector<2x192xf32> to vector<2x64xf32>
    %193 = arith.mulf %189, %192 : vector<2x64xf32>
    %194 = arith.addf %191, %193 : vector<2x64xf32>
    %195 = math.tanh %194 : vector<2x64xf32>
    %cst_35 = arith.constant 1.000000e+00 : f32
    %196 = vector.broadcast %cst_35 : f32 to vector<2x64xf32>
    %197 = arith.subf %196, %190 : vector<2x64xf32>
    %198 = arith.mulf %197, %195 : vector<2x64xf32>
    %199 = arith.mulf %190, %168 : vector<2x64xf32>
    %200 = arith.addf %198, %199 : vector<2x64xf32>
    %201 = math.tanh %200 : vector<2x64xf32>
    %202 = vector.extract_strided_slice %174 {offsets = [2, 0], sizes = [2, 192], strides = [1, 1]} : vector<12x192xf32> to vector<2x192xf32>
    %203 = arith.truncf %201 : vector<2x64xf32> to vector<2x64xbf16>
    %cst_36 = arith.constant dense<0.000000e+00> : vector<2x192xf32>
    %204 = tpu.matmul %203, %3, %cst_36 {dimension_numbers = #tpu.dot_dimension_numbers<[1], [0], [0], [1], [0, 0, 1, 1], [], []>} : vector<2x64xbf16>, vector<64x192xbf16>, vector<2x192xf32> -> vector<2x192xf32>
    %205 = arith.addf %204, %176 : vector<2x192xf32>
    %206 = vector.extract_strided_slice %202 {offsets = [0, 0], sizes = [2, 128], strides = [1, 1]} : vector<2x192xf32> to vector<2x128xf32>
    %207 = vector.extract_strided_slice %205 {offsets = [0, 0], sizes = [2, 128], strides = [1, 1]} : vector<2x192xf32> to vector<2x128xf32>
    %208 = arith.addf %206, %207 : vector<2x128xf32>
    %209 = arith.negf %208 : vector<2x128xf32>
    %210 = math.exp %209 : vector<2x128xf32>
    %cst_37 = arith.constant 1.000000e+00 : f32
    %211 = vector.broadcast %cst_37 : f32 to vector<2x128xf32>
    %212 = arith.addf %211, %210 : vector<2x128xf32>
    %213 = arith.divf %211, %212 : vector<2x128xf32>
    %214 = vector.extract_strided_slice %213 {offsets = [0, 0], sizes = [2, 64], strides = [1, 1]} : vector<2x128xf32> to vector<2x64xf32>
    %215 = vector.extract_strided_slice %213 {offsets = [0, 64], sizes = [2, 64], strides = [1, 1]} : vector<2x128xf32> to vector<2x64xf32>
    %216 = vector.extract_strided_slice %202 {offsets = [0, 128], sizes = [2, 64], strides = [1, 1]} : vector<2x192xf32> to vector<2x64xf32>
    %217 = vector.extract_strided_slice %205 {offsets = [0, 128], sizes = [2, 64], strides = [1, 1]} : vector<2x192xf32> to vector<2x64xf32>
    %218 = arith.mulf %214, %217 : vector<2x64xf32>
    %219 = arith.addf %216, %218 : vector<2x64xf32>
    %220 = math.tanh %219 : vector<2x64xf32>
    %cst_38 = arith.constant 1.000000e+00 : f32
    %221 = vector.broadcast %cst_38 : f32 to vector<2x64xf32>
    %222 = arith.subf %221, %215 : vector<2x64xf32>
    %223 = arith.mulf %222, %220 : vector<2x64xf32>
    %224 = arith.mulf %215, %201 : vector<2x64xf32>
    %225 = arith.addf %223, %224 : vector<2x64xf32>
    %226 = math.tanh %225 : vector<2x64xf32>
    %227 = vector.extract_strided_slice %174 {offsets = [4, 0], sizes = [2, 192], strides = [1, 1]} : vector<12x192xf32> to vector<2x192xf32>
    %228 = arith.truncf %226 : vector<2x64xf32> to vector<2x64xbf16>
    %cst_39 = arith.constant dense<0.000000e+00> : vector<2x192xf32>
    %229 = tpu.matmul %228, %3, %cst_39 {dimension_numbers = #tpu.dot_dimension_numbers<[1], [0], [0], [1], [0, 0, 1, 1], [], []>} : vector<2x64xbf16>, vector<64x192xbf16>, vector<2x192xf32> -> vector<2x192xf32>
    %230 = arith.addf %229, %176 : vector<2x192xf32>
    %231 = vector.extract_strided_slice %227 {offsets = [0, 0], sizes = [2, 128], strides = [1, 1]} : vector<2x192xf32> to vector<2x128xf32>
    %232 = vector.extract_strided_slice %230 {offsets = [0, 0], sizes = [2, 128], strides = [1, 1]} : vector<2x192xf32> to vector<2x128xf32>
    %233 = arith.addf %231, %232 : vector<2x128xf32>
    %234 = arith.negf %233 : vector<2x128xf32>
    %235 = math.exp %234 : vector<2x128xf32>
    %cst_40 = arith.constant 1.000000e+00 : f32
    %236 = vector.broadcast %cst_40 : f32 to vector<2x128xf32>
    %237 = arith.addf %236, %235 : vector<2x128xf32>
    %238 = arith.divf %236, %237 : vector<2x128xf32>
    %239 = vector.extract_strided_slice %238 {offsets = [0, 0], sizes = [2, 64], strides = [1, 1]} : vector<2x128xf32> to vector<2x64xf32>
    %240 = vector.extract_strided_slice %238 {offsets = [0, 64], sizes = [2, 64], strides = [1, 1]} : vector<2x128xf32> to vector<2x64xf32>
    %241 = vector.extract_strided_slice %227 {offsets = [0, 128], sizes = [2, 64], strides = [1, 1]} : vector<2x192xf32> to vector<2x64xf32>
    %242 = vector.extract_strided_slice %230 {offsets = [0, 128], sizes = [2, 64], strides = [1, 1]} : vector<2x192xf32> to vector<2x64xf32>
    %243 = arith.mulf %239, %242 : vector<2x64xf32>
    %244 = arith.addf %241, %243 : vector<2x64xf32>
    %245 = math.tanh %244 : vector<2x64xf32>
    %cst_41 = arith.constant 1.000000e+00 : f32
    %246 = vector.broadcast %cst_41 : f32 to vector<2x64xf32>
    %247 = arith.subf %246, %240 : vector<2x64xf32>
    %248 = arith.mulf %247, %245 : vector<2x64xf32>
    %249 = arith.mulf %240, %226 : vector<2x64xf32>
    %250 = arith.addf %248, %249 : vector<2x64xf32>
    %251 = math.tanh %250 : vector<2x64xf32>
    %252 = vector.extract_strided_slice %174 {offsets = [6, 0], sizes = [2, 192], strides = [1, 1]} : vector<12x192xf32> to vector<2x192xf32>
    %253 = arith.truncf %251 : vector<2x64xf32> to vector<2x64xbf16>
    %cst_42 = arith.constant dense<0.000000e+00> : vector<2x192xf32>
    %254 = tpu.matmul %253, %3, %cst_42 {dimension_numbers = #tpu.dot_dimension_numbers<[1], [0], [0], [1], [0, 0, 1, 1], [], []>} : vector<2x64xbf16>, vector<64x192xbf16>, vector<2x192xf32> -> vector<2x192xf32>
    %255 = arith.addf %254, %176 : vector<2x192xf32>
    %256 = vector.extract_strided_slice %252 {offsets = [0, 0], sizes = [2, 128], strides = [1, 1]} : vector<2x192xf32> to vector<2x128xf32>
    %257 = vector.extract_strided_slice %255 {offsets = [0, 0], sizes = [2, 128], strides = [1, 1]} : vector<2x192xf32> to vector<2x128xf32>
    %258 = arith.addf %256, %257 : vector<2x128xf32>
    %259 = arith.negf %258 : vector<2x128xf32>
    %260 = math.exp %259 : vector<2x128xf32>
    %cst_43 = arith.constant 1.000000e+00 : f32
    %261 = vector.broadcast %cst_43 : f32 to vector<2x128xf32>
    %262 = arith.addf %261, %260 : vector<2x128xf32>
    %263 = arith.divf %261, %262 : vector<2x128xf32>
    %264 = vector.extract_strided_slice %263 {offsets = [0, 0], sizes = [2, 64], strides = [1, 1]} : vector<2x128xf32> to vector<2x64xf32>
    %265 = vector.extract_strided_slice %263 {offsets = [0, 64], sizes = [2, 64], strides = [1, 1]} : vector<2x128xf32> to vector<2x64xf32>
    %266 = vector.extract_strided_slice %252 {offsets = [0, 128], sizes = [2, 64], strides = [1, 1]} : vector<2x192xf32> to vector<2x64xf32>
    %267 = vector.extract_strided_slice %255 {offsets = [0, 128], sizes = [2, 64], strides = [1, 1]} : vector<2x192xf32> to vector<2x64xf32>
    %268 = arith.mulf %264, %267 : vector<2x64xf32>
    %269 = arith.addf %266, %268 : vector<2x64xf32>
    %270 = math.tanh %269 : vector<2x64xf32>
    %cst_44 = arith.constant 1.000000e+00 : f32
    %271 = vector.broadcast %cst_44 : f32 to vector<2x64xf32>
    %272 = arith.subf %271, %265 : vector<2x64xf32>
    %273 = arith.mulf %272, %270 : vector<2x64xf32>
    %274 = arith.mulf %265, %251 : vector<2x64xf32>
    %275 = arith.addf %273, %274 : vector<2x64xf32>
    %276 = math.tanh %275 : vector<2x64xf32>
    %277 = vector.extract_strided_slice %174 {offsets = [8, 0], sizes = [2, 192], strides = [1, 1]} : vector<12x192xf32> to vector<2x192xf32>
    %278 = arith.truncf %276 : vector<2x64xf32> to vector<2x64xbf16>
    %cst_45 = arith.constant dense<0.000000e+00> : vector<2x192xf32>
    %279 = tpu.matmul %278, %3, %cst_45 {dimension_numbers = #tpu.dot_dimension_numbers<[1], [0], [0], [1], [0, 0, 1, 1], [], []>} : vector<2x64xbf16>, vector<64x192xbf16>, vector<2x192xf32> -> vector<2x192xf32>
    %280 = arith.addf %279, %176 : vector<2x192xf32>
    %281 = vector.extract_strided_slice %277 {offsets = [0, 0], sizes = [2, 128], strides = [1, 1]} : vector<2x192xf32> to vector<2x128xf32>
    %282 = vector.extract_strided_slice %280 {offsets = [0, 0], sizes = [2, 128], strides = [1, 1]} : vector<2x192xf32> to vector<2x128xf32>
    %283 = arith.addf %281, %282 : vector<2x128xf32>
    %284 = arith.negf %283 : vector<2x128xf32>
    %285 = math.exp %284 : vector<2x128xf32>
    %cst_46 = arith.constant 1.000000e+00 : f32
    %286 = vector.broadcast %cst_46 : f32 to vector<2x128xf32>
    %287 = arith.addf %286, %285 : vector<2x128xf32>
    %288 = arith.divf %286, %287 : vector<2x128xf32>
    %289 = vector.extract_strided_slice %288 {offsets = [0, 0], sizes = [2, 64], strides = [1, 1]} : vector<2x128xf32> to vector<2x64xf32>
    %290 = vector.extract_strided_slice %288 {offsets = [0, 64], sizes = [2, 64], strides = [1, 1]} : vector<2x128xf32> to vector<2x64xf32>
    %291 = vector.extract_strided_slice %277 {offsets = [0, 128], sizes = [2, 64], strides = [1, 1]} : vector<2x192xf32> to vector<2x64xf32>
    %292 = vector.extract_strided_slice %280 {offsets = [0, 128], sizes = [2, 64], strides = [1, 1]} : vector<2x192xf32> to vector<2x64xf32>
    %293 = arith.mulf %289, %292 : vector<2x64xf32>
    %294 = arith.addf %291, %293 : vector<2x64xf32>
    %295 = math.tanh %294 : vector<2x64xf32>
    %cst_47 = arith.constant 1.000000e+00 : f32
    %296 = vector.broadcast %cst_47 : f32 to vector<2x64xf32>
    %297 = arith.subf %296, %290 : vector<2x64xf32>
    %298 = arith.mulf %297, %295 : vector<2x64xf32>
    %299 = arith.mulf %290, %276 : vector<2x64xf32>
    %300 = arith.addf %298, %299 : vector<2x64xf32>
    %301 = math.tanh %300 : vector<2x64xf32>
    %302 = vector.extract_strided_slice %174 {offsets = [10, 0], sizes = [2, 192], strides = [1, 1]} : vector<12x192xf32> to vector<2x192xf32>
    %303 = arith.truncf %301 : vector<2x64xf32> to vector<2x64xbf16>
    %cst_48 = arith.constant dense<0.000000e+00> : vector<2x192xf32>
    %304 = tpu.matmul %303, %3, %cst_48 {dimension_numbers = #tpu.dot_dimension_numbers<[1], [0], [0], [1], [0, 0, 1, 1], [], []>} : vector<2x64xbf16>, vector<64x192xbf16>, vector<2x192xf32> -> vector<2x192xf32>
    %305 = arith.addf %304, %176 : vector<2x192xf32>
    %306 = vector.extract_strided_slice %302 {offsets = [0, 0], sizes = [2, 128], strides = [1, 1]} : vector<2x192xf32> to vector<2x128xf32>
    %307 = vector.extract_strided_slice %305 {offsets = [0, 0], sizes = [2, 128], strides = [1, 1]} : vector<2x192xf32> to vector<2x128xf32>
    %308 = arith.addf %306, %307 : vector<2x128xf32>
    %309 = arith.negf %308 : vector<2x128xf32>
    %310 = math.exp %309 : vector<2x128xf32>
    %cst_49 = arith.constant 1.000000e+00 : f32
    %311 = vector.broadcast %cst_49 : f32 to vector<2x128xf32>
    %312 = arith.addf %311, %310 : vector<2x128xf32>
    %313 = arith.divf %311, %312 : vector<2x128xf32>
    %314 = vector.extract_strided_slice %313 {offsets = [0, 0], sizes = [2, 64], strides = [1, 1]} : vector<2x128xf32> to vector<2x64xf32>
    %315 = vector.extract_strided_slice %313 {offsets = [0, 64], sizes = [2, 64], strides = [1, 1]} : vector<2x128xf32> to vector<2x64xf32>
    %316 = vector.extract_strided_slice %302 {offsets = [0, 128], sizes = [2, 64], strides = [1, 1]} : vector<2x192xf32> to vector<2x64xf32>
    %317 = vector.extract_strided_slice %305 {offsets = [0, 128], sizes = [2, 64], strides = [1, 1]} : vector<2x192xf32> to vector<2x64xf32>
    %318 = arith.mulf %314, %317 : vector<2x64xf32>
    %319 = arith.addf %316, %318 : vector<2x64xf32>
    %320 = math.tanh %319 : vector<2x64xf32>
    %cst_50 = arith.constant 1.000000e+00 : f32
    %321 = vector.broadcast %cst_50 : f32 to vector<2x64xf32>
    %322 = arith.subf %321, %315 : vector<2x64xf32>
    %323 = arith.mulf %322, %320 : vector<2x64xf32>
    %324 = arith.mulf %315, %301 : vector<2x64xf32>
    %325 = arith.addf %323, %324 : vector<2x64xf32>
    %326 = math.tanh %325 : vector<2x64xf32>
    %327 = tpu.concatenate %201, %226, %251, %276, %301, %326 in 0 : vector<2x64xf32>, vector<2x64xf32>, vector<2x64xf32>, vector<2x64xf32>, vector<2x64xf32>, vector<2x64xf32> -> vector<12x64xf32>
    %cst_51 = arith.constant dense<0.000000e+00> : vector<12x2xf32>
    %328 = tpu.matmul %327, %8, %cst_51 {dimension_numbers = #tpu.dot_dimension_numbers<[1], [0], [0], [1], [0, 0, 1, 1], [], []>} : vector<12x64xf32>, vector<64x2xf32>, vector<12x2xf32> -> vector<12x2xf32>
    %329 = vector.broadcast %7 : vector<1x2xf32> to vector<12x2xf32>
    %330 = arith.addf %328, %329 : vector<12x2xf32>
    %cst_52 = arith.constant dense<0xFF800000> : vector<12xf32>
    %331 = vector.multi_reduction <maximumf>, %330, %cst_52 [1] : vector<12x2xf32> to vector<12xf32>
    %332 = vector.shape_cast %331 : vector<12xf32> to vector<12x1xf32>
    %333 = vector.broadcast %332 : vector<12x1xf32> to vector<12x2xf32>
    %334 = arith.subf %330, %333 : vector<12x2xf32>
    %335 = math.exp %334 : vector<12x2xf32>
    %cst_53 = arith.constant dense<0.000000e+00> : vector<12xf32>
    %336 = vector.multi_reduction <add>, %335, %cst_53 [1] : vector<12x2xf32> to vector<12xf32>
    %337 = vector.shape_cast %336 : vector<12xf32> to vector<12x1xf32>
    %338 = math.log %337 : vector<12x1xf32>
    %339 = vector.broadcast %338 : vector<12x1xf32> to vector<12x2xf32>
    %340 = arith.subf %334, %339 : vector<12x2xf32>
    %c0_54 = arith.constant 0 : index
    %c0_55 = arith.constant 0 : index
    %341 = vector.load %arg4[%c0_54, %c0_55] : memref<12x2xf32, #tpu.memory_space<vmem>>, vector<12x2xf32>
    tpu.vector_store %arg4[%c0_54, %c0_55], %340 {strides = array<i32>} : memref<12x2xf32, #tpu.memory_space<vmem>>, vector<12x2xf32>,
    return
  }
}

</mosaic_0001>

<bundles_post_ra>
// kernel: tpu_custom_call.1
= control target key start
LH: loop header
LB: loop body
LE: loop exit
PB: predicated region body
PF: predicated region fallthrough
CT: control target
= control target key end

     0   :  { %9 = vsyncpa [#allocation3], 0  ;;  %s2421_s0 = inlined_call_operand.hbm [shape: f32[16,64], index: 0, kind: input, shape index: {}]   ;;  %s2422_s1 = inlined_call_operand.hbm [shape: f32[12,32], index: 1, kind: input, shape index: {}]   ;;  %s2423_s2 = inlined_call_operand.hbm [shape: bf16[224,256], index: 2, kind: input, shape index: {}]   ;;  %s2424_s3 = inlined_call_operand.hbm [shape: f32[72,256], index: 3, kind: input, shape index: {}]   ;;  %s2425_s4 = inlined_call_operand.vmem [shape: f32[12,2], index: 4, kind: output, shape index: {}]  }
   0x1   :  { %10 = vsyncpa [#allocation5], 0 }
   0x2   :  { %11 = vsyncpa [#allocation8], 0  ;;  %s2019_s15 = smov [#allocation4]   ;;  %s2020_s17 = smov [#allocation2]  }
   0x3   :  { %s29_s16 = sshll.u32 %s2019_s15, 4  ;;  %s17_s18 = sshll.u32 %s2020_s17, 4  ;;  %s30_s16 = int_to_ptr.vmem [resolvable:$true] %s29_s16  ;;  %s2054_s18 = int_to_ptr.vmem [resolvable:$true] %s17_s18 }
   0x4   :  { %s1925_s21 = scalar_lea.hbm %s2422_s1, 256 }
   0x5   :  { %p1926_p0 = scmp.ne.s32.totalorder %s2422_s1, %s1925_s21  ;;  %p1929_p1 = scmp.lt.u32.totalorder %s1925_s21, %s2422_s1 }
   0x7   :  { %p1931_p2 = pnand %p1929_p1, %p1926_p0 }
   0x9   :  { %1934 = shalt.err (!%p1931_p2)
}
   0xa   :  { %s1935_s26 = scalar_lea.vmem %s30_s16, 256  ;;  %p1940_p4 = scmp.lt.s32.totalorder %s30_s16, %s30_s16 }
   0xb   :  { %p1936_p3 = scmp.ne.s32.totalorder %s30_s16, %s1935_s26  ;;  %p1941_p5 = scmp.lt.s32.totalorder %s1935_s26, %s1935_s26 }
   0xd   :  { %p1942_p6 = por %p1941_p5, %p1940_p4 }
   0xf   :  { %p1943_p7 = pnand %p1942_p6, %p1936_p3 }
  0x11   :  { %1946 = shalt.err (!%p1943_p7)
}
  0x12   :  { %s2021_s27 = smov 128   ;;  %s2022_s28 = smov 8  }
  0x13   :  { %35 = dma.hbm_to_vmem [thread:$0]  %s2422_s1, 256, %s30_s16, [#allocation5], %s2021_s27, %s2021_s27, %s2022_s28  }
  0x14   :  { %s1947_s7 = scalar_lea.hbm %s2421_s0, 256 }
  0x15   :  { %p1948_p8 = scmp.ne.s32.totalorder %s2421_s0, %s1947_s7  ;;  %p1951_p9 = scmp.lt.u32.totalorder %s1947_s7, %s2421_s0 }
  0x17   :  { %p1953_p10 = pnand %p1951_p9, %p1948_p8 }
  0x19   :  { %1956 = shalt.err (!%p1953_p10)
}
  0x1a   :  { %s1957_s12 = scalar_lea.vmem %s2054_s18, 256  ;;  %p1962_p12 = scmp.lt.s32.totalorder %s2054_s18, %s2054_s18 }
  0x1b   :  { %p1958_p11 = scmp.ne.s32.totalorder %s2054_s18, %s1957_s12  ;;  %p1963_p13 = scmp.lt.s32.totalorder %s1957_s12, %s1957_s12 }
  0x1d   :  { %p1964_p0 = por %p1963_p13, %p1962_p12 }
  0x1f   :  { %p1965_p1 = pnand %p1964_p0, %p1958_p11 }
  0x21   :  { %1968 = shalt.err (!%p1965_p1)
}
  0x22   :  { %23 = dma.hbm_to_vmem [thread:$0]  %s2421_s0, 256, %s2054_s18, [#allocation3], %s2021_s27, %s2021_s27, %s2022_s28  }
  0x23   :  { %s2023_s14 = smov [#allocation6]   ;;  %s2024_s16 = smov [#allocation7]  }
  0x24   :  { %s41_s15 = sshll.u32 %s2023_s14, 4  ;;  %s53_s17 = sshll.u32 %s2024_s16, 4  ;;  %s42_s15 = int_to_ptr.vmem [resolvable:$true] %s41_s15  ;;  %s2091_s17 = int_to_ptr.vmem [resolvable:$true] %s53_s17 }
  0x25   :  { %s1969_s21 = scalar_lea.hbm %s2423_s2, 3584 }
  0x26   :  { %p1970_p2 = scmp.ne.s32.totalorder %s2423_s2, %s1969_s21  ;;  %p1973_p3 = scmp.lt.u32.totalorder %s1969_s21, %s2423_s2 }
  0x28   :  { %p1975_p4 = pnand %p1973_p3, %p1970_p2 }
  0x2a   :  { %1978 = shalt.err (!%p1975_p4)
}
  0x2b   :  { %s1979_s0 = scalar_lea.vmem %s42_s15, 3584  ;;  %p1984_p6 = scmp.lt.s32.totalorder %s42_s15, %s42_s15 }
  0x2c   :  { %p1980_p5 = scmp.ne.s32.totalorder %s42_s15, %s1979_s0  ;;  %p1985_p7 = scmp.lt.s32.totalorder %s1979_s0, %s1979_s0 }
  0x2e   :  { %p1986_p8 = por %p1985_p7, %p1984_p6 }
  0x30   :  { %p1987_p9 = pnand %p1986_p8, %p1980_p5 }
  0x32   :  { %1990 = shalt.err (!%p1987_p9)
}
  0x33   :  { %47 = dma.hbm_to_vmem [thread:$0]  %s2423_s2, 3584, %s42_s15, [#allocation5], %s2021_s27, %s2021_s27, %s2022_s28  }
  0x34   :  { %s1991_s5 = scalar_lea.hbm %s2424_s3, 2304 }
  0x35   :  { %p1992_p10 = scmp.ne.s32.totalorder %s2424_s3, %s1991_s5  ;;  %p1995_p11 = scmp.lt.u32.totalorder %s1991_s5, %s2424_s3 }
  0x37   :  { %p1997_p12 = pnand %p1995_p11, %p1992_p10 }
  0x39   :  { %2000 = shalt.err (!%p1997_p12)
}
  0x3a   :  { %s2001_s10 = scalar_lea.vmem %s2091_s17, 2304  ;;  %p2006_p0 = scmp.lt.s32.totalorder %s2091_s17, %s2091_s17 }
  0x3b   :  { %p2002_p13 = scmp.ne.s32.totalorder %s2091_s17, %s2001_s10  ;;  %p2007_p1 = scmp.lt.s32.totalorder %s2001_s10, %s2001_s10 }
  0x3d   :  { %p2008_p2 = por %p2007_p1, %p2006_p0 }
  0x3f   :  { %p2009_p3 = pnand %p2008_p2, %p2002_p13 }
  0x41   :  { %2012 = shalt.err (!%p2009_p3)
}
  0x42   :  { %s2025_s2 = smov 256   ;;  %s2026_s27 = smov 16  }
  0x43   :  { %59 = dma.hbm_to_vmem [thread:$0]  %s2424_s3, 2304, %s2091_s17, [#allocation8], %s2025_s2, %s2025_s2, %s2026_s27  }
  0x44   :  { %2013 = dma.done.wait [#allocation3], 256  }
  0x45   :  { %2014 = vsyncadd [#allocation3], 4294967040 }
  0x46   :  { %2015 = dma.done.wait [#allocation5], 3840  }
  0x47   :  { %2016 = vsyncadd [#allocation5], 4294963456 }
  0x48   :  { %2017 = dma.done.wait [#allocation8], 2304  }
  0x49   :  { %2018 = vsyncadd [#allocation8], 4294964992  ;;  %v2027_v0 = vmov 0   ;;  %v1723_v1 = vld [vmem:[#allocation6 + $0x4] ss:$8 sps:$4 sm:$0xff]   ;;  %vm171_vm0 = vcmask 523264   ;;  %v121_v22 = vlaneseq }
  0x4a   :  { %207 = vmatprep.mubr.bf16.mxu0 %v2027_v0  ;;  %293 = vmatprep.mubr.bf16.mxu1 %v2027_v0  ;;  %v2127_v2 = vld [vmem:[#allocation6 + $0x44] ss:$8 sps:$4 sm:$0xff]   ;;  %v1727_v3 = vld [vmem:[#allocation6] ss:$8 sps:$4 sm:$0xff]   ;;  %v1729_v5 = vld [vmem:[#allocation6 + $0x14] ss:$8 sps:$4 sm:$0xff]  }
  0x4b   :  { %175 = vmatprep.subr.bf16.mxu0 %v1723_v1  ;;  %v2129_v4 = vld [vmem:[#allocation6 + $0x40] ss:$8 sps:$4 sm:$0xff]   ;;  %261 = vmatprep.subr.bf16.mxu1 %v2127_v2  ;;  %v2133_v6 = vld [vmem:[#allocation6 + $0x54] ss:$8 sps:$4 sm:$0xff]   ;;  %v1733_v7 = vld [vmem:[#allocation6 + $0x10] ss:$8 sps:$4 sm:$0xff]  }
  0x4c   :  { %176 = vmatpush1.bf16.msra.mxu0 %v1727_v3  ;;  %262 = vmatpush1.bf16.msra.mxu1 %v2129_v4  ;;  %v2135_v8 = vld [vmem:[#allocation6 + $0x50] ss:$8 sps:$4 sm:$0xff]   ;;  %v1735_v9 = vld [vmem:[#allocation6 + $0x24] ss:$8 sps:$4 sm:$0xff]   ;;  %v1739_v11 = vld [vmem:[#allocation6 + $0x20] ss:$8 sps:$4 sm:$0xff]  }
  0x4d   :  { %177 = vmatprep.subr.bf16.mxu0 %v1729_v5  ;;  %263 = vmatprep.subr.bf16.mxu1 %v2133_v6  ;;  %v2138_v10 = vld [vmem:[#allocation6 + $0x64] ss:$8 sps:$4 sm:$0xff]   ;;  %v2140_v12 = vld [vmem:[#allocation6 + $0x60] ss:$8 sps:$4 sm:$0xff]   ;;  %v1741_v13 = vld [vmem:[#allocation6 + $0x34] ss:$8 sps:$4 sm:$0xff]  }
  0x4e   :  { %v2144_v14 = vld [vmem:[#allocation6 + $0x74] ss:$8 sps:$4 sm:$0xff]   ;;  %v115_v15 = vld [vmem:[#allocation2] sm:$0xff]  ;;  %v1745_v16 = vld [vmem:[#allocation6 + $0x30] ss:$8 sps:$4 sm:$0xff]   ;;  %v122_v23 = vshrl.u32 %v121_v22, 7 }
  0x4f   :  { %v116_v17 = vld [vmem:[#allocation2 + $0x8] sm:$0xff]  ;;  %1765 = vtanh.f32 %v115_v15  ;;  %v2147_v18 = vld [vmem:[#allocation6 + $0x70] ss:$8 sps:$4 sm:$0xff]   ;;  %s2028_s3 = smov 64   ;;  %vm928_vm1 = vcmask 261120   ;;  %vm1474_vm2 = vcmask 1041408  }
  0x50   :  { %178 = vmatpush1.bf16.msra.mxu0 %v1733_v7  ;;  %264 = vmatpush1.bf16.msra.mxu1 %v2135_v8  ;;  %1767 = vtanh.f32 %v116_v17  ;;  %v2173_v24 = vsub.s32 0, %v122_v23  ;;  %v101_v25 = vld [vmem:[#allocation7] ss:$8 sm:$0x3]  ;;  %v2176_v31 = vsub.s32 1, %v122_v23  ;;  %vm1476_vm3 = vcmask 1043456  }
  0x51   :  { %179 = vmatprep.subr.bf16.mxu0 %v1735_v9  ;;  %265 = vmatprep.subr.bf16.mxu1 %v2138_v10  ;;  %vm1478_vm4 = vcmask 1045504   ;;  %vm1570_vm5 = vcmask 11264   ;;  %vm1566_vm6 = vcmask 15360  }
  0x52   :  { %v124_v29 = vrot.slane %v101_v25, %v2173_v24  ;;  %v128_v35 = vrot.slane %v101_v25, %v2176_v31 }
  0x54   :  { %180 = vmatpush1.bf16.msra.mxu0 %v1739_v11  ;;  %266 = vmatpush1.bf16.msra.mxu1 %v2140_v12 }
  0x55   :  { %181 = vmatprep.subr.bf16.mxu0 %v1741_v13  ;;  %267 = vmatprep.subr.bf16.mxu1 %v2144_v14 }
  0x58   :  { %182 = vmatpush1.bf16.msra.mxu0 %v1745_v16  ;;  %268 = vmatpush1.bf16.msra.mxu1 %v2147_v18 }
  0x59   :  { %333 = vmatprep.subr.bf16.mxu0 %v2127_v2  ;;  %415 = vmatprep.subr.bf16.mxu1 %v2127_v2  ;;  %v1766_v19 = vpop.eup %1765 }
  0x5a   :  { %v1768_v20 = vpop.eup %1767 }
  0x5b   :  { %294 = vmatmul.mubr.bf16.vlgmr.msra.gmra.mrb[0].mxu1 %v2027_v0  ;;  %v119_v21 = vpack.c.bf16 %v1768_v20, %v1766_v19 }
  0x5c   :  { %416 = vmatpush1.bf16.msra.mxu1 %v2129_v4  ;;  %447 = vmatprep.mubr.bf16.mxu1 %v2027_v0 }
  0x5d   :  { %417 = vmatprep.subr.bf16.mxu1 %v2133_v6  ;;  %1609 = vmatmul.mubr.msk.bf16.vlgmr.msra.gmra.mrb[0].mxu0 %vm171_vm0, %v119_v21 }
  0x5e   :  { %334 = vmatpush1.bf16.msra.mxu0 %v2129_v4  ;;  %365 = vmatprep.mubr.bf16.mxu0 %v2027_v0 }
  0x5f   :  { %335 = vmatprep.subr.bf16.mxu0 %v2133_v6 }
  0x60   :  { %418 = vmatpush1.bf16.msra.mxu1 %v2135_v8 }
  0x61   :  { %419 = vmatprep.subr.bf16.mxu1 %v2138_v10 }
  0x62   :  { %336 = vmatpush1.bf16.msra.mxu0 %v2135_v8 }
  0x63   :  { %337 = vmatprep.subr.bf16.mxu0 %v2138_v10 }
  0x64   :  { %420 = vmatpush1.bf16.msra.mxu1 %v2140_v12 }
  0x65   :  { %421 = vmatprep.subr.bf16.mxu1 %v2144_v14 }
  0x66   :  { %338 = vmatpush1.bf16.msra.mxu0 %v2140_v12 }
  0x67   :  { %339 = vmatprep.subr.bf16.mxu0 %v2144_v14 }
  0x68   :  { %422 = vmatpush1.bf16.msra.mxu1 %v2147_v18 }
  0x69   :  { %579 = vmatprep.subr.bf16.mxu1 %v2127_v2 }
  0x6a   :  { %340 = vmatpush1.bf16.msra.mxu0 %v2147_v18 }
  0x6b   :  { %497 = vmatprep.subr.bf16.mxu0 %v2127_v2 }
 0x12e   :  { %v295_v26 = vpop.f32.mrb[0].mxu1 }
 0x12f   :  { %v297_v27 = vpop.f32.mrb[1].mxu1 }
 0x130   :  { %v299_v28 = vpop.f32.mrb[2].mxu1  ;;  %v209_v32 = vpop.f32.mrb[0].mxu0 }
 0x131   :  { %v300_v30 = vpop.f32.mrb[3].mxu1  ;;  %v2178_v33 = vadd.f32 %v209_v32, %v124_v29  ;;  %v211_v34 = vpop.f32.mrb[1].mxu0 }
 0x132   :  { %v213_v36 = vpop.f32.mrb[2].mxu0  ;;  %v2186_v42 = vadd.f32 %v211_v34, %v128_v35 }
 0x133   :  { %v302_v37 = vadd.f32 %v295_v26, %v2178_v33  ;;  %v2182_v38 = vadd.f32 %v213_v36, %v124_v29  ;;  %v215_v39 = vpop.f32.mrb[3].mxu0 }
 0x134   :  { %v2184_v40 = vadd.f32 %v215_v39, %v128_v35  ;;  %v303_v43 = vadd.f32 %v297_v27, %v2186_v42 }
 0x135   :  { %v1618_v41 = vmul.f32 -1.442695, %v302_v37 }
 0x136   :  { %v1619_v49 = vmul.f32 -1.442695, %v303_v43 }
 0x137   :  { %1769 = vpow2.f32 %v1618_v41 }
 0x138   :  { %1771 = vtanh.f32 %v303_v43 }
 0x141   :  { %v1770_v44 = vpop.eup %1769 }
 0x142   :  { %v310_v45 = vadd.f32 1.0, %v1770_v44  ;;  %v1772_v46 = vpop.eup %1771 }
 0x144   :  { %1773 = vrcp.f32 %v310_v45 }
 0x145   :  { %1775 = vpow2.f32 %v1619_v49 }
 0x14e   :  { %v1774_v47 = vpop.eup %1773 }
 0x14f   :  { %v318_v48 = vmul.f32 %v1774_v47, %v1772_v46  ;;  %v1776_v50 = vpop.eup %1775  ;;  %v317_v52 = vmul.f32 0.0, %v1774_v47 }
 0x150   :  { %v311_v51 = vadd.f32 1.0, %v1776_v50 }
 0x151   :  { %320 = vrot.lane.b32.xlu0 %v318_v48, %s2028_s3 }
 0x152   :  { %1777 = vrcp.f32 %v311_v51 }
 0x15c   :  { %v1778_v55 = vpop.eup %1777 }
 0x1c3   :  { %v321_v53 = vpop.permute.xlu0 %320 }
 0x1c4   :  { %v323_v54 = vadd.f32 %v321_v53, %v317_v52 }
 0x1c6   :  { %1779 = vtanh.f32 %v323_v54  ;;  %v396_v16 = vrot.slane %v323_v54, 6 }
 0x1d0   :  { %v1780_v56 = vpop.eup %1779 }
 0x1d1   :  { %v325_v57 = vmul.f32 %v1780_v56, %v1778_v55 }
 0x1d3   :  { %v326_v58 = vpack.c.bf16 %v325_v57, %v325_v57 }
 0x1d5   :  { %328 = vrot.lane.b32.xlu0 %v326_v58, %s2028_s3 }
 0x247   :  { %v329_v59 = vpop.permute.xlu0 %328 }
 0x248   :  { %1620 = vmatmul.mubr.msk.bf16.vlgmr.msra.gmra.mrb[4].mxu0 %vm171_vm0, %v329_v59 }
 0x249   :  { %498 = vmatpush1.bf16.msra.mxu0 %v2129_v4  ;;  %529 = vmatprep.mubr.bf16.mxu0 %v2027_v0 }
 0x24a   :  { %499 = vmatprep.subr.bf16.mxu0 %v2133_v6 }
 0x24d   :  { %500 = vmatpush1.bf16.msra.mxu0 %v2135_v8 }
 0x24e   :  { %501 = vmatprep.subr.bf16.mxu0 %v2138_v10 }
 0x251   :  { %502 = vmatpush1.bf16.msra.mxu0 %v2140_v12 }
 0x252   :  { %503 = vmatprep.subr.bf16.mxu0 %v2144_v14 }
 0x255   :  { %504 = vmatpush1.bf16.msra.mxu0 %v2147_v18 }
 0x256   :  { %654 = vmatprep.subr.bf16.mxu0 %v2127_v2 }
 0x31b   :  { %v367_v60 = vpop.f32.mrb[4].mxu0 }
 0x31c   :  { %v376_v61 = vrot.slane %v367_v60, 6  ;;  %v369_v62 = vpop.f32.mrb[5].mxu0 }
 0x31d   :  { %v371_v63 = vpop.f32.mrb[6].mxu0  ;;  %v377_v7 = vrot.slane %v369_v62, 6 }
 0x31e   :  { %v380_v1 = vadd.f32 %v376_v61, %v2178_v33  ;;  %v372_v3 = vpop.f32.mrb[7].mxu0 }
 0x31f   :  { %v381_v9 = vadd.f32 %v377_v7, %v2186_v42 }
 0x320   :  { %v1621_v5 = vmul.f32 -1.442695, %v380_v1 }
 0x321   :  { %v1622_v21 = vmul.f32 -1.442695, %v381_v9 }
 0x322   :  { %1781 = vpow2.f32 %v1621_v5 }
 0x323   :  { %1783 = vtanh.f32 %v381_v9 }
 0x32c   :  { %v1782_v11 = vpop.eup %1781 }
 0x32d   :  { %v388_v13 = vadd.f32 1.0, %v1782_v11  ;;  %v1784_v15 = vpop.eup %1783 }
 0x32f   :  { %1785 = vrcp.f32 %v388_v13 }
 0x330   :  { %1787 = vpow2.f32 %v1622_v21 }
 0x339   :  { %v1786_v17 = vpop.eup %1785 }
 0x33a   :  { %v399_v19 = vmul.f32 %v1786_v17, %v1784_v15  ;;  %v398_v20 = vmul.f32 %v1786_v17, %v396_v16  ;;  %v1788_v22 = vpop.eup %1787 }
 0x33b   :  { %v389_v23 = vadd.f32 1.0, %v1788_v22 }
 0x33c   :  { %401 = vrot.lane.b32.xlu1 %v399_v19, %s2028_s3 }
 0x33d   :  { %1789 = vrcp.f32 %v389_v23 }
 0x347   :  { %v1790_v27 = vpop.eup %1789 }
 0x3ae   :  { %v402_v25 = vpop.permute.xlu1 %401 }
 0x3af   :  { %v404_v26 = vadd.f32 %v402_v25, %v398_v20 }
 0x3b1   :  { %1791 = vtanh.f32 %v404_v26  ;;  %v478_v50 = vrot.slane %v404_v26, 6 }
 0x3bb   :  { %v1792_v28 = vpop.eup %1791 }
 0x3bc   :  { %v406_v29 = vmul.f32 %v1792_v28, %v1790_v27 }
 0x3be   :  { %v407_v30 = vpack.c.bf16 %v406_v29, %v406_v29 }
 0x3c0   :  { %v409_v32 = vrot.slane %v407_v30, 1 }
 0x3c2   :  { %410 = vrot.lane.b32.xlu1 %v409_v32, %s2028_s3 }
 0x434   :  { %v411_v34 = vpop.permute.xlu1 %410 }
 0x435   :  { %1623 = vmatmul.mubr.msk.bf16.vlgmr.msra.gmra.mrb[4].mxu1 %vm171_vm0, %v411_v34 }
 0x436   :  { %580 = vmatpush1.bf16.msra.mxu1 %v2129_v4  ;;  %611 = vmatprep.mubr.bf16.mxu1 %v2027_v0 }
 0x437   :  { %581 = vmatprep.subr.bf16.mxu1 %v2133_v6 }
 0x43a   :  { %582 = vmatpush1.bf16.msra.mxu1 %v2135_v8 }
 0x43b   :  { %583 = vmatprep.subr.bf16.mxu1 %v2138_v10 }
 0x43e   :  { %584 = vmatpush1.bf16.msra.mxu1 %v2140_v12 }
 0x43f   :  { %585 = vmatprep.subr.bf16.mxu1 %v2144_v14 }
 0x442   :  { %586 = vmatpush1.bf16.msra.mxu1 %v2147_v18 }
 0x443   :  { %736 = vmatprep.subr.bf16.mxu1 %v2127_v2 }
 0x508   :  { %v449_v35 = vpop.f32.mrb[4].mxu1 }
 0x509   :  { %v458_v36 = vrot.slane %v449_v35, 4  ;;  %v451_v37 = vpop.f32.mrb[5].mxu1 }
 0x50a   :  { %v453_v39 = vpop.f32.mrb[6].mxu1  ;;  %v459_v45 = vrot.slane %v451_v37, 4 }
 0x50b   :  { %v462_v41 = vadd.f32 %v458_v36, %v2178_v33  ;;  %v454_v43 = vpop.f32.mrb[7].mxu1 }
 0x50c   :  { %v463_v46 = vadd.f32 %v459_v45, %v2186_v42 }
 0x50d   :  { %v1624_v44 = vmul.f32 -1.442695, %v462_v41 }
 0x50e   :  { %v1625_v54 = vmul.f32 -1.442695, %v463_v46 }
 0x50f   :  { %1793 = vpow2.f32 %v1624_v44 }
 0x510   :  { %1795 = vtanh.f32 %v463_v46 }
 0x519   :  { %v1794_v47 = vpop.eup %1793 }
 0x51a   :  { %v470_v48 = vadd.f32 1.0, %v1794_v47  ;;  %v1796_v49 = vpop.eup %1795 }
 0x51c   :  { %1797 = vrcp.f32 %v470_v48 }
 0x51d   :  { %1799 = vpow2.f32 %v1625_v54 }
 0x526   :  { %v1798_v51 = vpop.eup %1797 }
 0x527   :  { %v481_v52 = vmul.f32 %v1798_v51, %v1796_v49  ;;  %v480_v53 = vmul.f32 %v1798_v51, %v478_v50  ;;  %v1800_v55 = vpop.eup %1799 }
 0x528   :  { %v471_v56 = vadd.f32 1.0, %v1800_v55 }
 0x529   :  { %483 = vrot.lane.b32.xlu0 %v481_v52, %s2028_s3 }
 0x52a   :  { %1801 = vrcp.f32 %v471_v56 }
 0x534   :  { %v1802_v59 = vpop.eup %1801 }
 0x59b   :  { %v484_v57 = vpop.permute.xlu0 %483 }
 0x59c   :  { %v486_v58 = vadd.f32 %v484_v57, %v480_v53 }
 0x59e   :  { %1803 = vtanh.f32 %v486_v58  ;;  %v560_v22 = vrot.slane %v486_v58, 6 }
 0x5a8   :  { %v1804_v60 = vpop.eup %1803 }
 0x5a9   :  { %v488_v61 = vmul.f32 %v1804_v60, %v1802_v59 }
 0x5ab   :  { %v489_v62 = vpack.c.bf16 %v488_v61, %v488_v61 }
 0x5ad   :  { %v491_v63 = vrot.slane %v489_v62, 2 }
 0x5af   :  { %492 = vrot.lane.b32.xlu1 %v491_v63, %s2028_s3 }
 0x621   :  { %v493_v1 = vpop.permute.xlu1 %492 }
 0x622   :  { %1626 = vmatmul.mubr.msk.bf16.vlgmr.msra.gmra.mrb[8].mxu0 %vm171_vm0, %v493_v1 }
 0x623   :  { %655 = vmatpush1.bf16.msra.mxu0 %v2129_v4  ;;  %686 = vmatprep.mubr.bf16.mxu0 %v2027_v0 }
 0x624   :  { %656 = vmatprep.subr.bf16.mxu0 %v2133_v6 }
 0x627   :  { %657 = vmatpush1.bf16.msra.mxu0 %v2135_v8 }
 0x628   :  { %658 = vmatprep.subr.bf16.mxu0 %v2138_v10 }
 0x62b   :  { %659 = vmatpush1.bf16.msra.mxu0 %v2140_v12 }
 0x62c   :  { %660 = vmatprep.subr.bf16.mxu0 %v2144_v14 }
 0x62f   :  { %661 = vmatpush1.bf16.msra.mxu0 %v2147_v18 }
 0x630   :  { %818 = vmatprep.subr.bf16.mxu0 %v2127_v2 }
 0x6f5   :  { %v531_v3 = vpop.f32.mrb[8].mxu0 }
 0x6f6   :  { %v540_v5 = vrot.slane %v531_v3, 2  ;;  %v533_v7 = vpop.f32.mrb[9].mxu0 }
 0x6f7   :  { %v535_v9 = vpop.f32.mrb[10].mxu0  ;;  %v541_v16 = vrot.slane %v533_v7, 2 }
 0x6f8   :  { %v544_v11 = vadd.f32 %v540_v5, %v2178_v33  ;;  %v536_v13 = vpop.f32.mrb[11].mxu0 }
 0x6f9   :  { %v545_v17 = vadd.f32 %v541_v16, %v2186_v42 }
 0x6fa   :  { %v1627_v15 = vmul.f32 -1.442695, %v544_v11 }
 0x6fb   :  { %v1628_v26 = vmul.f32 -1.442695, %v545_v17 }
 0x6fc   :  { %1805 = vpow2.f32 %v1627_v15 }
 0x6fd   :  { %1807 = vtanh.f32 %v545_v17 }
 0x706   :  { %v1806_v19 = vpop.eup %1805 }
 0x707   :  { %v552_v20 = vadd.f32 1.0, %v1806_v19  ;;  %v1808_v21 = vpop.eup %1807 }
 0x709   :  { %1809 = vrcp.f32 %v552_v20 }
 0x70a   :  { %1811 = vpow2.f32 %v1628_v26 }
 0x713   :  { %v1810_v23 = vpop.eup %1809 }
 0x714   :  { %v563_v2 = vmul.f32 %v1810_v23, %v1808_v21  ;;  %v562_v25 = vmul.f32 %v1810_v23, %v560_v22  ;;  %v1812_v33 = vpop.eup %1811 }
 0x715   :  { %v553_v27 = vadd.f32 1.0, %v1812_v33 }
 0x716   :  { %565 = vrot.lane.b32.xlu0 %v563_v2, %s2028_s3 }
 0x717   :  { %1813 = vrcp.f32 %v553_v27 }
 0x721   :  { %v1814_v42 = vpop.eup %1813 }
 0x788   :  { %v566_v28 = vpop.permute.xlu0 %565 }
 0x789   :  { %v568_v29 = vadd.f32 %v566_v28, %v562_v25 }
 0x78b   :  { %1815 = vtanh.f32 %v568_v29  ;;  %v636_v50 = vrot.slane %v568_v29, 6 }
 0x795   :  { %v1816_v30 = vpop.eup %1815 }
 0x796   :  { %v570_v32 = vmul.f32 %v1816_v30, %v1814_v42 }
 0x798   :  { %v571_v34 = vpack.c.bf16 %v570_v32, %v570_v32 }
 0x79a   :  { %v573_v35 = vrot.slane %v571_v34, 3 }
 0x79c   :  { %574 = vrot.lane.b32.xlu1 %v573_v35, %s2028_s3 }
 0x80e   :  { %v575_v36 = vpop.permute.xlu1 %574 }
 0x80f   :  { %1629 = vmatmul.mubr.msk.bf16.vlgmr.msra.gmra.mrb[8].mxu1 %vm171_vm0, %v575_v36 }
 0x810   :  { %737 = vmatpush1.bf16.msra.mxu1 %v2129_v4  ;;  %768 = vmatprep.mubr.bf16.mxu1 %v2027_v0 }
 0x811   :  { %738 = vmatprep.subr.bf16.mxu1 %v2133_v6 }
 0x814   :  { %739 = vmatpush1.bf16.msra.mxu1 %v2135_v8 }
 0x815   :  { %740 = vmatprep.subr.bf16.mxu1 %v2138_v10 }
 0x818   :  { %741 = vmatpush1.bf16.msra.mxu1 %v2140_v12 }
 0x819   :  { %742 = vmatprep.subr.bf16.mxu1 %v2144_v14 }
 0x81c   :  { %743 = vmatpush1.bf16.msra.mxu1 %v2147_v18 }
 0x8e2   :  { %v613_v37 = vpop.f32.mrb[8].mxu1 }
 0x8e3   :  { %v620_v39 = vadd.f32 %v613_v37, %v2182_v38  ;;  %v615_v41 = vpop.f32.mrb[9].mxu1 }
 0x8e4   :  { %v617_v43 = vpop.f32.mrb[10].mxu1  ;;  %v621_v46 = vadd.f32 %v615_v41, %v2184_v40 }
 0x8e5   :  { %v1630_v44 = vmul.f32 -1.442695, %v620_v39  ;;  %v618_v45 = vpop.f32.mrb[11].mxu1 }
 0x8e6   :  { %v1631_v54 = vmul.f32 -1.442695, %v621_v46 }
 0x8e7   :  { %1817 = vpow2.f32 %v1630_v44 }
 0x8e8   :  { %1819 = vtanh.f32 %v621_v46 }
 0x8f1   :  { %v1818_v47 = vpop.eup %1817 }
 0x8f2   :  { %v628_v48 = vadd.f32 1.0, %v1818_v47  ;;  %v1820_v49 = vpop.eup %1819 }
 0x8f4   :  { %1821 = vrcp.f32 %v628_v48 }
 0x8f5   :  { %1823 = vpow2.f32 %v1631_v54 }
 0x8fe   :  { %v1822_v51 = vpop.eup %1821 }
 0x8ff   :  { %v639_v52 = vmul.f32 %v1822_v51, %v1820_v49  ;;  %v638_v53 = vmul.f32 %v1822_v51, %v636_v50  ;;  %v1824_v55 = vpop.eup %1823 }
 0x900   :  { %v629_v56 = vadd.f32 1.0, %v1824_v55 }
 0x901   :  { %641 = vrot.lane.b32.xlu0 %v639_v52, %s2028_s3 }
 0x902   :  { %1825 = vrcp.f32 %v629_v56 }
 0x90c   :  { %v1826_v59 = vpop.eup %1825 }
 0x973   :  { %v642_v57 = vpop.permute.xlu0 %641 }
 0x974   :  { %v644_v58 = vadd.f32 %v642_v57, %v638_v53 }
 0x976   :  { %1827 = vtanh.f32 %v644_v58 }
 0x980   :  { %v1828_v60 = vpop.eup %1827 }
 0x981   :  { %v646_v61 = vmul.f32 %v1828_v60, %v1826_v59 }
 0x983   :  { %v647_v62 = vpack.c.bf16 %v646_v61, %v646_v61 }
 0x985   :  { %649 = vrot.lane.b32.xlu1 %v647_v62, %s2028_s3 }
 0x9f7   :  { %v650_v63 = vpop.permute.xlu1 %649 }
 0x9f8   :  { %1632 = vmatmul.mubr.msk.bf16.vlgmr.msra.gmra.mrb[12].mxu0 %vm171_vm0, %v650_v63 }
 0x9f9   :  { %819 = vmatpush1.bf16.msra.mxu0 %v2129_v4  ;;  %850 = vmatprep.mubr.bf16.mxu0 %v2027_v0 }
 0x9fa   :  { %820 = vmatprep.subr.bf16.mxu0 %v2133_v6 }
 0x9fd   :  { %821 = vmatpush1.bf16.msra.mxu0 %v2135_v8 }
 0x9fe   :  { %822 = vmatprep.subr.bf16.mxu0 %v2138_v10 }
 0xa01   :  { %823 = vmatpush1.bf16.msra.mxu0 %v2140_v12 }
 0xa02   :  { %824 = vmatprep.subr.bf16.mxu0 %v2144_v14  ;;  %v717_v14 = vrot.slane %v644_v58, 6 }
 0xa05   :  { %825 = vmatpush1.bf16.msra.mxu0 %v2147_v18 }
 0xacb   :  { %v688_v1 = vpop.f32.mrb[12].mxu0 }
 0xacc   :  { %v697_v3 = vrot.slane %v688_v1, 6  ;;  %v690_v5 = vpop.f32.mrb[13].mxu0 }
 0xacd   :  { %v692_v7 = vpop.f32.mrb[14].mxu0  ;;  %v698_v6 = vrot.slane %v690_v5, 6 }
 0xace   :  { %v701_v4 = vadd.f32 %v697_v3, %v2182_v38  ;;  %v693_v9 = vpop.f32.mrb[15].mxu0 }
 0xacf   :  { %v702_v8 = vadd.f32 %v698_v6, %v2184_v40 }
 0xad0   :  { %v1633_v11 = vmul.f32 -1.442695, %v701_v4 }
 0xad1   :  { %v1634_v17 = vmul.f32 -1.442695, %v702_v8 }
 0xad2   :  { %1829 = vpow2.f32 %v1633_v11 }
 0xad3   :  { %1831 = vtanh.f32 %v702_v8 }
 0xadc   :  { %v1830_v13 = vpop.eup %1829 }
 0xadd   :  { %v709_v10 = vadd.f32 1.0, %v1830_v13  ;;  %v1832_v12 = vpop.eup %1831 }
 0xadf   :  { %1833 = vrcp.f32 %v709_v10 }
 0xae0   :  { %1835 = vpow2.f32 %v1634_v17  ;;  %v2272_v17 = vld [vmem:[#allocation6 + $0xa0] ss:$8 sps:$4 sm:$0xff]  }
 0xae9   :  { %v1834_v15 = vpop.eup %1833 }
 0xaea   :  { %v720_v18 = vmul.f32 %v1834_v15, %v1832_v12  ;;  %v719_v16 = vmul.f32 %v1834_v15, %v717_v14  ;;  %v1836_v19 = vpop.eup %1835  ;;  %v1747_v12 = vld [vmem:[#allocation6 + $0x80] ss:$8 sps:$4 sm:$0xff]   ;;  %v1749_v14 = vld [vmem:[#allocation6 + $0x84] ss:$8 sps:$4 sm:$0xff]   ;;  %v892_v15 = vld [vmem:[#allocation4] sm:$0xff] }
 0xaeb   :  { %v710_v20 = vadd.f32 1.0, %v1836_v19  ;;  %932 = vmatprep.subr.bf16.mxu1 %v1749_v14  ;;  %v2274_v19 = vld [vmem:[#allocation6 + $0xb4] ss:$8 sps:$4 sm:$0xff]  }
 0xaec   :  { %722 = vrot.lane.b32.xlu0 %v720_v18, %s2028_s3  ;;  %v893_v18 = vld [vmem:[#allocation4 + $0x8] sm:$0xf] }
 0xaed   :  { %1837 = vrcp.f32 %v710_v20  ;;  %v2279_v20 = vld [vmem:[#allocation6 + $0xb0] ss:$8 sps:$4 sm:$0xff]  }
 0xaf7   :  { %v1838_v23 = vpop.eup %1837 }
 0xb5e   :  { %v723_v21 = vpop.permute.xlu0 %722 }
 0xb5f   :  { %v725_v22 = vadd.f32 %v723_v21, %v719_v16  ;;  %v2270_v16 = vld [vmem:[#allocation6 + $0xa4] ss:$8 sps:$4 sm:$0xff]  }
 0xb60   :  { %1104 = vmatprep.subr.bf16.mxu0 %v2270_v16  ;;  %v2282_v21 = vld [vmem:[#allocation6 + $0xc4] ss:$8 sps:$4 sm:$0xff]  }
 0xb61   :  { %1839 = vtanh.f32 %v725_v22  ;;  %v799_v44 = vrot.slane %v725_v22, 6  ;;  %v2286_v22 = vld [vmem:[#allocation6 + $0xc0] ss:$8 sps:$4 sm:$0xff]  }
 0xb6b   :  { %v1840_v2 = vpop.eup %1839 }
 0xb6c   :  { %v727_v25 = vmul.f32 %v1840_v2, %v1838_v23  ;;  %v2288_v2 = vld [vmem:[#allocation6 + $0xd4] ss:$8 sps:$4 sm:$0xff]  }
 0xb6e   :  { %v728_v26 = vpack.c.bf16 %v727_v25, %v727_v25 }
 0xb70   :  { %v730_v33 = vrot.slane %v728_v26, 1 }
 0xb72   :  { %731 = vrot.lane.b32.xlu1 %v730_v33, %s2028_s3  ;;  %v2292_v33 = vld [vmem:[#allocation6 + $0xd0] ss:$8 sps:$4 sm:$0xff]  }
 0xbe4   :  { %v732_v27 = vpop.permute.xlu1 %731 }
 0xbe5   :  { %1635 = vmatmul.mubr.msk.bf16.vlgmr.msra.gmra.mrb[12].mxu1 %vm171_vm0, %v732_v27 }
 0xbe6   :  { %964 = vmatprep.mubr.bf16.mxu1 %v2027_v0  ;;  %933 = vmatpush1.bf16.msra.mxu1 %v1747_v12 }
 0xcb8   :  { %v770_v28 = vpop.f32.mrb[12].mxu1 }
 0xcb9   :  { %v779_v29 = vrot.slane %v770_v28, 4  ;;  %v772_v42 = vpop.f32.mrb[13].mxu1 }
 0xcba   :  { %v774_v30 = vpop.f32.mrb[14].mxu1  ;;  %v780_v36 = vrot.slane %v772_v42, 4 }
 0xcbb   :  { %v783_v32 = vadd.f32 %v779_v29, %v2182_v38  ;;  %v775_v34 = vpop.f32.mrb[15].mxu1 }
 0xcbc   :  { %v784_v37 = vadd.f32 %v780_v36, %v2184_v40 }
 0xcbd   :  { %v1636_v35 = vmul.f32 -1.442695, %v783_v32 }
 0xcbe   :  { %v1637_v48 = vmul.f32 -1.442695, %v784_v37 }
 0xcbf   :  { %1841 = vpow2.f32 %v1636_v35 }
 0xcc0   :  { %1843 = vtanh.f32 %v784_v37 }
 0xcc9   :  { %v1842_v39 = vpop.eup %1841 }
 0xcca   :  { %v791_v41 = vadd.f32 1.0, %v1842_v39  ;;  %v1844_v43 = vpop.eup %1843  ;;  %v103_v39 = vld [vmem:[#allocation7 + $0x1] ss:$8 sm:$0x3] }
 0xccc   :  { %1845 = vrcp.f32 %v791_v41  ;;  %v901_v41 = vrot.slane %v103_v39, %v2173_v24 }
 0xccd   :  { %1847 = vpow2.f32 %v1637_v48 }
 0xcd6   :  { %v1846_v45 = vpop.eup %1845 }
 0xcd7   :  { %v802_v46 = vmul.f32 %v1846_v45, %v1844_v43  ;;  %v801_v47 = vmul.f32 %v1846_v45, %v799_v44  ;;  %v1848_v49 = vpop.eup %1847  ;;  %v905_v44 = vrot.slane %v103_v39, %v2176_v31 }
 0xcd8   :  { %v792_v50 = vadd.f32 1.0, %v1848_v49 }
 0xcd9   :  { %804 = vrot.lane.b32.xlu0 %v802_v46, %s2028_s3 }
 0xcda   :  { %1849 = vrcp.f32 %v792_v50 }
 0xce4   :  { %v1850_v53 = vpop.eup %1849 }
 0xd4b   :  { %v805_v51 = vpop.permute.xlu0 %804 }
 0xd4c   :  { %v807_v52 = vadd.f32 %v805_v51, %v801_v47  ;;  %v105_v51 = vld [vmem:[#allocation7 + $0x2] ss:$8 sm:$0x3] }
 0xd4e   :  { %1851 = vtanh.f32 %v807_v52  ;;  %v881_v6 = vrot.slane %v807_v52, 6  ;;  %v2323_v52 = vrot.slane %v105_v51, %v2173_v24 }
 0xd58   :  { %v1852_v54 = vpop.eup %1851 }
 0xd59   :  { %v809_v55 = vmul.f32 %v1852_v54, %v1850_v53 }
 0xd5b   :  { %v810_v56 = vpack.c.bf16 %v809_v55, %v809_v55 }
 0xd5d   :  { %v812_v57 = vrot.slane %v810_v56, 2 }
 0xd5f   :  { %813 = vrot.lane.b32.xlu1 %v812_v57, %s2028_s3 }
 0xdd1   :  { %v814_v58 = vpop.permute.xlu1 %813 }
 0xdd2   :  { %1638 = vmatmul.mubr.msk.bf16.vlgmr.msra.gmra.mrb[16].mxu0 %vm171_vm0, %v814_v58 }
 0xdd3   :  { %1136 = vmatprep.mubr.bf16.mxu0 %v2027_v0  ;;  %1105 = vmatpush1.bf16.msra.mxu0 %v2272_v17 }
 0xdd4   :  { %1106 = vmatprep.subr.bf16.mxu0 %v2274_v19 }
 0xdd7   :  { %1107 = vmatpush1.bf16.msra.mxu0 %v2279_v20 }
 0xdd8   :  { %1108 = vmatprep.subr.bf16.mxu0 %v2282_v21 }
 0xddb   :  { %1109 = vmatpush1.bf16.msra.mxu0 %v2286_v22 }
 0xddc   :  { %1110 = vmatprep.subr.bf16.mxu0 %v2288_v2 }
 0xddf   :  { %1111 = vmatpush1.bf16.msra.mxu0 %v2292_v33 }
 0xde0   :  { %1258 = vmatprep.subr.bf16.mxu0 %v2270_v16 }
 0xea5   :  { %v852_v59 = vpop.f32.mrb[16].mxu0 }
 0xea6   :  { %v861_v60 = vrot.slane %v852_v59, 2  ;;  %v854_v61 = vpop.f32.mrb[17].mxu0 }
 0xea7   :  { %v856_v62 = vpop.f32.mrb[18].mxu0  ;;  %v862_v5 = vrot.slane %v854_v61, 2 }
 0xea8   :  { %v865_v63 = vadd.f32 %v861_v60, %v2182_v38  ;;  %v857_v1 = vpop.f32.mrb[19].mxu0  ;;  %v1752_v38 = vld [vmem:[#allocation6 + $0x94] ss:$8 sps:$4 sm:$0xff]  }
 0xea9   :  { %v866_v7 = vadd.f32 %v862_v5, %v2184_v40  ;;  %v1750_v40 = vld [vmem:[#allocation6 + $0x90] ss:$8 sps:$4 sm:$0xff]   ;;  %934 = vmatprep.subr.bf16.mxu1 %v1752_v38 }
 0xeaa   :  { %v1639_v3 = vmul.f32 -1.442695, %v865_v63  ;;  %935 = vmatpush1.bf16.msra.mxu1 %v1750_v40  ;;  %v2330_v63 = vrot.slane %v105_v51, %v2176_v31 }
 0xeab   :  { %1034 = vmatprep.subr.bf16.mxu1 %v2270_v16  ;;  %v1640_v27 = vmul.f32 -1.442695, %v866_v7 }
 0xeac   :  { %1853 = vpow2.f32 %v1639_v3 }
 0xead   :  { %1855 = vtanh.f32 %v866_v7 }
 0xeb6   :  { %v1854_v4 = vpop.eup %1853 }
 0xeb7   :  { %v873_v9 = vadd.f32 1.0, %v1854_v4  ;;  %v1856_v11 = vpop.eup %1855 }
 0xeb9   :  { %1857 = vrcp.f32 %v873_v9 }
 0xeba   :  { %1859 = vtanh.f32 %v892_v15 }
 0xebb   :  { %1861 = vtanh.f32 %v893_v18 }
 0xebc   :  { %1863 = vpow2.f32 %v1640_v27 }
 0xec3   :  { %v1858_v8 = vpop.eup %1857 }
 0xec4   :  { %v884_v13 = vmul.f32 %v1858_v8, %v1856_v11  ;;  %v883_v10 = vmul.f32 %v1858_v8, %v881_v6  ;;  %v1860_v23 = vpop.eup %1859 }
 0xec5   :  { %v1862_v25 = vpop.eup %1861 }
 0xec6   :  { %886 = vrot.lane.b32.xlu0 %v884_v13, %s2028_s3  ;;  %v896_v26 = vpack.c.bf16 %v1862_v25, %v1860_v23  ;;  %v1864_v28 = vpop.eup %1863 }
 0xec7   :  { %v874_v29 = vadd.f32 1.0, %v1864_v28 }
 0xec8   :  { %1645 = vmatmul.mubr.msk.bf16.vlgmr.msra.gmra.mrb[16].mxu1 %vm928_vm1, %v896_v26 }
 0xec9   :  { %1035 = vmatpush1.bf16.msra.mxu1 %v2272_v17  ;;  %1066 = vmatprep.mubr.bf16.mxu1 %v2027_v0  ;;  %1865 = vrcp.f32 %v874_v29 }
 0xeca   :  { %1036 = vmatprep.subr.bf16.mxu1 %v2274_v19 }
 0xecd   :  { %1037 = vmatpush1.bf16.msra.mxu1 %v2279_v20 }
 0xece   :  { %1038 = vmatprep.subr.bf16.mxu1 %v2282_v21 }
 0xed1   :  { %1039 = vmatpush1.bf16.msra.mxu1 %v2286_v22 }
 0xed2   :  { %1040 = vmatprep.subr.bf16.mxu1 %v2288_v2 }
 0xed3   :  { %v1866_v32 = vpop.eup %1865 }
 0xed5   :  { %1041 = vmatpush1.bf16.msra.mxu1 %v2292_v33 }
 0xed6   :  { %1181 = vmatprep.subr.bf16.mxu1 %v2270_v16 }
 0xf38   :  { %v887_v42 = vpop.permute.xlu0 %886 }
 0xf39   :  { %v889_v30 = vadd.f32 %v887_v42, %v883_v10 }
 0xf3b   :  { %1867 = vtanh.f32 %v889_v30 }
 0xf45   :  { %v1868_v34 = vpop.eup %1867 }
 0xf46   :  { %v891_v35 = vmul.f32 %v1868_v34, %v1866_v32 }
 0xf48   :  { %v986_v36 = vpack.c.bf16 %v891_v35, %v891_v35  ;;  %v1092_v1 = vrot.slane %v891_v35, 6 }
 0xf4a   :  { %v988_v37 = vrot.slane %v986_v36, 3 }
 0xf4c   :  { %989 = vrot.lane.b32.xlu1 %v988_v37, %s2028_s3 }
 0xf9b   :  { %v966_v43 = vpop.f32.mrb[16].mxu1 }
 0xf9c   :  { %v968_v45 = vpop.f32.mrb[17].mxu1  ;;  %v2325_v54 = vadd.f32 %v966_v43, %v901_v41 }
 0xf9d   :  { %v970_v46 = vpop.f32.mrb[18].mxu1  ;;  %v2333_v5 = vadd.f32 %v968_v45, %v905_v44 }
 0xf9e   :  { %v2308_v47 = vadd.f32 %v970_v46, %v901_v41  ;;  %v972_v48 = vpop.f32.mrb[19].mxu1 }
 0xf9f   :  { %v2310_v49 = vadd.f32 %v972_v48, %v905_v44 }
 0xfbe   :  { %v990_v50 = vpop.permute.xlu1 %989 }
 0xfbf   :  { %1654 = vmatmul.mubr.msk.bf16.vlgmr.msra.gmra.mrb[20].mxu1 %vm171_vm0, %v990_v50 }
 0xfc0   :  { %1182 = vmatpush1.bf16.msra.mxu1 %v2272_v17  ;;  %1213 = vmatprep.mubr.bf16.mxu1 %v2027_v0 }
 0xfc1   :  { %1183 = vmatprep.subr.bf16.mxu1 %v2274_v19 }
 0xfc4   :  { %1184 = vmatpush1.bf16.msra.mxu1 %v2279_v20 }
 0xfc5   :  { %1185 = vmatprep.subr.bf16.mxu1 %v2282_v21 }
 0xfc8   :  { %1186 = vmatpush1.bf16.msra.mxu1 %v2286_v22 }
 0xfc9   :  { %1187 = vmatprep.subr.bf16.mxu1 %v2288_v2 }
 0xfcc   :  { %1188 = vmatpush1.bf16.msra.mxu1 %v2292_v33 }
 0xfcd   :  { %1335 = vmatprep.subr.bf16.mxu1 %v2270_v16 }
0x1092   :  { %v1068_v53 = vpop.f32.mrb[20].mxu1 }
0x1093   :  { %v1069_v55 = vadd.f32 %v1068_v53, %v2323_v52  ;;  %v1070_v56 = vpop.f32.mrb[21].mxu1 }
0x1094   :  { %v1072_v57 = vpop.f32.mrb[22].mxu1  ;;  %v1071_v24 = vadd.f32 %v1070_v56, %v2330_v63 }
0x1095   :  { %v1075_v58 = vadd.f32 %v1069_v55, %v2325_v54  ;;  %v1073_v59 = vpop.f32.mrb[23].mxu1 }
0x1097   :  { %v1655_v60 = vmul.f32 -1.442695, %v1075_v58 }
0x1099   :  { %1869 = vpow2.f32 %v1655_v60 }
0x10a3   :  { %v1870_v61 = vpop.eup %1869 }
0x10a4   :  { %v1079_v62 = vadd.f32 1.0, %v1870_v61 }
0x10a6   :  { %1871 = vrcp.f32 %v1079_v62 }
0x10b0   :  { %v1872_v3 = vpop.eup %1871 }
0x10b1   :  { %v1082_v7 = vmul.f32 %v1872_v3, %v1071_v24  ;;  %v1094_v4 = vmul.f32 %v1872_v3, %v1092_v1  ;;  %v1085_v6 = vsub.f32 1.0, %v1872_v3 }
0x10b3   :  { %v1083_v9 = vadd.f32 %v1082_v7, %v2333_v5 }
0x10b5   :  { %1873 = vtanh.f32 %v1083_v9 }
0x10bf   :  { %v1874_v11 = vpop.eup %1873 }
0x10c0   :  { %1087 = vrot.lane.b32.xlu0 %v1874_v11, %s2028_s3 }
0x1132   :  { %v1088_v8 = vpop.permute.xlu0 %1087 }
0x1133   :  { %v1090_v13 = vmul.f32 %v1088_v8, %v1085_v6 }
0x1135   :  { %v1095_v10 = vadd.f32 %v1094_v4, %v1090_v13 }
0x1137   :  { %1875 = vtanh.f32 %v1095_v10 }
0x1141   :  { %v2337_v31 = vpop.eup %1875 }
0x1142   :  { %v1097_v12 = vpack.c.bf16 %v2337_v31, %v2337_v31  ;;  %v1168_v37 = vrot.slane %v2337_v31, 6 }
0x1144   :  { %1099 = vrot.lane.b32.xlu1 %v1097_v12, %s2028_s3 }
0x11b6   :  { %v1100_v14 = vpop.permute.xlu1 %1099 }
0x11b7   :  { %1656 = vmatmul.mubr.msk.bf16.vlgmr.msra.gmra.mrb[20].mxu0 %vm171_vm0, %v1100_v14 }
0x11b8   :  { %1259 = vmatpush1.bf16.msra.mxu0 %v2272_v17  ;;  %1290 = vmatprep.mubr.bf16.mxu0 %v2027_v0 }
0x11b9   :  { %1260 = vmatprep.subr.bf16.mxu0 %v2274_v19 }
0x11bc   :  { %1261 = vmatpush1.bf16.msra.mxu0 %v2279_v20 }
0x11bd   :  { %1262 = vmatprep.subr.bf16.mxu0 %v2282_v21 }
0x11c0   :  { %1263 = vmatpush1.bf16.msra.mxu0 %v2286_v22 }
0x11c1   :  { %1264 = vmatprep.subr.bf16.mxu0 %v2288_v2 }
0x11c4   :  { %1265 = vmatpush1.bf16.msra.mxu0 %v2292_v33 }
0x11c5   :  { %1405 = vmatprep.subr.bf16.mxu0 %v2270_v16 }
0x128a   :  { %v1138_v38 = vpop.f32.mrb[20].mxu0 }
0x128b   :  { %v1139_v15 = vadd.f32 %v1138_v38, %v2323_v52  ;;  %v1140_v18 = vpop.f32.mrb[21].mxu0 }
0x128c   :  { %v1142_v40 = vpop.f32.mrb[22].mxu0  ;;  %v1141_v42 = vadd.f32 %v1140_v18, %v2330_v63 }
0x128d   :  { %v1146_v23 = vrot.slane %v1139_v15, 6  ;;  %v1143_v25 = vpop.f32.mrb[23].mxu0 }
0x128e   :  { %v1156_v30 = vrot.slane %v1141_v42, 6 }
0x128f   :  { %v1148_v26 = vadd.f32 %v1146_v23, %v2325_v54 }
0x1291   :  { %v1657_v27 = vmul.f32 -1.442695, %v1148_v26 }
0x1293   :  { %1877 = vpow2.f32 %v1657_v27 }
0x129d   :  { %v1878_v28 = vpop.eup %1877 }
0x129e   :  { %v1152_v29 = vadd.f32 1.0, %v1878_v28 }
0x12a0   :  { %1879 = vrcp.f32 %v1152_v29 }
0x12aa   :  { %v1880_v32 = vpop.eup %1879 }
0x12ab   :  { %v1158_v34 = vmul.f32 %v1880_v32, %v1156_v30  ;;  %v1161_v36 = vsub.f32 1.0, %v1880_v32  ;;  %v1170_v41 = vmul.f32 %v1880_v32, %v1168_v37 }
0x12ad   :  { %v1159_v16 = vadd.f32 %v1158_v34, %v2333_v5 }
0x12af   :  { %1881 = vtanh.f32 %v1159_v16 }
0x12b9   :  { %v1882_v35 = vpop.eup %1881 }
0x12ba   :  { %1163 = vrot.lane.b32.xlu0 %v1882_v35, %s2028_s3 }
0x132c   :  { %v1164_v39 = vpop.permute.xlu0 %1163 }
0x132d   :  { %v1166_v43 = vmul.f32 %v1164_v39, %v1161_v36 }
0x132f   :  { %v1171_v44 = vadd.f32 %v1170_v41, %v1166_v43 }
0x1331   :  { %1883 = vtanh.f32 %v1171_v44 }
0x133b   :  { %v1884_v45 = vpop.eup %1883 }
0x133c   :  { %v1173_v46 = vpack.c.bf16 %v1884_v45, %v1884_v45  ;;  %v1245_v3 = vrot.slane %v1884_v45, 6  ;;  %v1475_v38 = vsel %vm1474_vm2, %v2337_v31, %v1884_v45 }
0x133e   :  { %v1175_v48 = vrot.slane %v1173_v46, 1 }
0x1340   :  { %1176 = vrot.lane.b32.xlu1 %v1175_v48, %s2028_s3 }
0x13b2   :  { %v1177_v50 = vpop.permute.xlu1 %1176 }
0x13b3   :  { %1658 = vmatmul.mubr.msk.bf16.vlgmr.msra.gmra.mrb[24].mxu1 %vm171_vm0, %v1177_v50 }
0x13b4   :  { %1336 = vmatpush1.bf16.msra.mxu1 %v2272_v17  ;;  %1367 = vmatprep.mubr.bf16.mxu1 %v2027_v0 }
0x13b5   :  { %1337 = vmatprep.subr.bf16.mxu1 %v2274_v19 }
0x13b8   :  { %1338 = vmatpush1.bf16.msra.mxu1 %v2279_v20 }
0x13b9   :  { %1339 = vmatprep.subr.bf16.mxu1 %v2282_v21 }
0x13bc   :  { %1340 = vmatpush1.bf16.msra.mxu1 %v2286_v22 }
0x13bd   :  { %1341 = vmatprep.subr.bf16.mxu1 %v2288_v2 }
0x13c0   :  { %1342 = vmatpush1.bf16.msra.mxu1 %v2292_v33 }
0x1486   :  { %v1215_v51 = vpop.f32.mrb[24].mxu1 }
0x1487   :  { %v1216_v53 = vadd.f32 %v1215_v51, %v2323_v52  ;;  %v1217_v55 = vpop.f32.mrb[25].mxu1 }
0x1488   :  { %v1219_v56 = vpop.f32.mrb[26].mxu1  ;;  %v1218_v24 = vadd.f32 %v1217_v55, %v2330_v63 }
0x1489   :  { %v1223_v57 = vrot.slane %v1216_v53, 4  ;;  %v1220_v58 = vpop.f32.mrb[27].mxu1 }
0x148a   :  { %v1233_v1 = vrot.slane %v1218_v24, 4 }
0x148b   :  { %v1225_v59 = vadd.f32 %v1223_v57, %v2325_v54 }
0x148d   :  { %v1659_v60 = vmul.f32 -1.442695, %v1225_v59 }
0x148f   :  { %1885 = vpow2.f32 %v1659_v60 }
0x1499   :  { %v1886_v61 = vpop.eup %1885 }
0x149a   :  { %v1229_v62 = vadd.f32 1.0, %v1886_v61 }
0x149c   :  { %1887 = vrcp.f32 %v1229_v62 }
0x14a6   :  { %v1888_v7 = vpop.eup %1887 }
0x14a7   :  { %v1235_v4 = vmul.f32 %v1888_v7, %v1233_v1  ;;  %v1247_v9 = vmul.f32 %v1888_v7, %v1245_v3  ;;  %v1238_v8 = vsub.f32 1.0, %v1888_v7 }
0x14a9   :  { %v1236_v11 = vadd.f32 %v1235_v4, %v2333_v5 }
0x14ab   :  { %1889 = vtanh.f32 %v1236_v11 }
0x14b5   :  { %v1890_v6 = vpop.eup %1889 }
0x14b6   :  { %1240 = vrot.lane.b32.xlu0 %v1890_v6, %s2028_s3 }
0x1528   :  { %v1241_v13 = vpop.permute.xlu0 %1240 }
0x1529   :  { %v1243_v10 = vmul.f32 %v1241_v13, %v1238_v8 }
0x152b   :  { %v1248_v12 = vadd.f32 %v1247_v9, %v1243_v10 }
0x152d   :  { %1891 = vtanh.f32 %v1248_v12 }
0x1537   :  { %v1892_v14 = vpop.eup %1891 }
0x1538   :  { %v1250_v15 = vpack.c.bf16 %v1892_v14, %v1892_v14  ;;  %v1477_v18 = vsel %vm1476_vm3, %v1475_v38, %v1892_v14 }
0x153a   :  { %v1252_v40 = vrot.slane %v1250_v15, 2 }
0x153c   :  { %1253 = vrot.lane.b32.xlu1 %v1252_v40, %s2028_s3 }
0x15ae   :  { %v1254_v23 = vpop.permute.xlu1 %1253 }
0x15af   :  { %1660 = vmatmul.mubr.msk.bf16.vlgmr.msra.gmra.mrb[24].mxu0 %vm171_vm0, %v1254_v23 }
0x15b0   :  { %1406 = vmatpush1.bf16.msra.mxu0 %v2272_v17  ;;  %1437 = vmatprep.mubr.bf16.mxu0 %v2027_v0 }
0x15b1   :  { %1407 = vmatprep.subr.bf16.mxu0 %v2274_v19 }
0x15b4   :  { %1408 = vmatpush1.bf16.msra.mxu0 %v2279_v20 }
0x15b5   :  { %1409 = vmatprep.subr.bf16.mxu0 %v2282_v21 }
0x15b8   :  { %1410 = vmatpush1.bf16.msra.mxu0 %v2286_v22 }
0x15b9   :  { %1411 = vmatprep.subr.bf16.mxu0 %v2288_v2  ;;  %v1322_v2 = vrot.slane %v1892_v14, 6 }
0x15bc   :  { %1412 = vmatpush1.bf16.msra.mxu0 %v2292_v33 }
0x1682   :  { %v1292_v31 = vpop.f32.mrb[24].mxu0 }
0x1683   :  { %v1293_v25 = vadd.f32 %v1292_v31, %v2323_v52  ;;  %v1294_v26 = vpop.f32.mrb[25].mxu0 }
0x1684   :  { %v1296_v27 = vpop.f32.mrb[26].mxu0  ;;  %v1295_v21 = vadd.f32 %v1294_v26, %v2330_v63 }
0x1685   :  { %v1300_v17 = vrot.slane %v1293_v25, 2  ;;  %v1297_v28 = vpop.f32.mrb[27].mxu0 }
0x1686   :  { %v1310_v22 = vrot.slane %v1295_v21, 2 }
0x1687   :  { %v1302_v0 = vadd.f32 %v1300_v17, %v2325_v54 }
0x1689   :  { %v1661_v19 = vmul.f32 -1.442695, %v1302_v0  ;;  %v107_v0 = vld [vmem:[#allocation7 + $0x10] sm:$0xff] }
0x168b   :  { %1893 = vpow2.f32 %v1661_v19  ;;  %v108_v19 = vld [vmem:[#allocation7 + $0x20] sm:$0xff] }
0x1695   :  { %v1894_v20 = vpop.eup %1893 }
0x1696   :  { %v1306_v29 = vadd.f32 1.0, %v1894_v20  ;;  %v109_v20 = vld [vmem:[#allocation7 + $0x30] sm:$0xff] }
0x1698   :  { %1895 = vrcp.f32 %v1306_v29  ;;  %v110_v29 = vld [vmem:[#allocation7 + $0x40] sm:$0xff] }
0x1699   :  { %v1701_v21 = vpack.c.bf16 %v110_v29, %v109_v20 }
0x16a2   :  { %v1896_v42 = vpop.eup %1895 }
0x16a3   :  { %v1312_v33 = vmul.f32 %v1896_v42, %v1310_v22  ;;  %v1324_v30 = vmul.f32 %v1896_v42, %v1322_v2  ;;  %v1315_v16 = vsub.f32 1.0, %v1896_v42  ;;  %v111_v22 = vld [vmem:[#allocation7 + $0x50] sm:$0xff]  ;;  %v112_v2 = vld [vmem:[#allocation7 + $0x60] sm:$0xff] }
0x16a4   :  { %v113_v42 = vld [vmem:[#allocation7 + $0x70] sm:$0xff] }
0x16a5   :  { %v1313_v32 = vadd.f32 %v1312_v33, %v2333_v5  ;;  %v114_v33 = vld [vmem:[#allocation7 + $0x80] sm:$0xff] }
0x16a7   :  { %1897 = vtanh.f32 %v1313_v32 }
0x16b1   :  { %v1898_v34 = vpop.eup %1897 }
0x16b2   :  { %1317 = vrot.lane.b32.xlu0 %v1898_v34, %s2028_s3 }
0x1724   :  { %v1318_v54 = vpop.permute.xlu0 %1317 }
0x1725   :  { %v1320_v35 = vmul.f32 %v1318_v54, %v1315_v16 }
0x1727   :  { %v1325_v36 = vadd.f32 %v1324_v30, %v1320_v35 }
0x1729   :  { %1899 = vtanh.f32 %v1325_v36 }
0x1733   :  { %v1900_v37 = vpop.eup %1899 }
0x1734   :  { %v1327_v39 = vpack.c.bf16 %v1900_v37, %v1900_v37  ;;  %v1479_v41 = vsel %vm1478_vm4, %v1477_v18, %v1900_v37  ;;  %v1393_v58 = vrot.slane %v1900_v37, 6 }
0x1736   :  { %v1329_v43 = vrot.slane %v1327_v39, 3 }
0x1738   :  { %1330 = vrot.lane.b32.xlu1 %v1329_v43, %s2028_s3 }
0x17aa   :  { %v1331_v44 = vpop.permute.xlu1 %1330 }
0x17ab   :  { %1662 = vmatmul.mubr.msk.bf16.vlgmr.msra.gmra.mrb[28].mxu1 %vm171_vm0, %v1331_v44 }
0x187e   :  { %v1369_v5 = vpop.f32.mrb[28].mxu1 }
0x187f   :  { %v1370_v45 = vadd.f32 %v1369_v5, %v2323_v52  ;;  %v1371_v46 = vpop.f32.mrb[29].mxu1 }
0x1880   :  { %v1373_v48 = vpop.f32.mrb[30].mxu1  ;;  %v1372_v57 = vadd.f32 %v1371_v46, %v2330_v63 }
0x1881   :  { %v1376_v50 = vadd.f32 %v1370_v45, %v2308_v47  ;;  %v1374_v51 = vpop.f32.mrb[31].mxu1 }
0x1883   :  { %v1663_v53 = vmul.f32 -1.442695, %v1376_v50 }
0x1885   :  { %1901 = vpow2.f32 %v1663_v53 }
0x188f   :  { %v1902_v55 = vpop.eup %1901 }
0x1890   :  { %v1380_v56 = vadd.f32 1.0, %v1902_v55 }
0x1892   :  { %1903 = vrcp.f32 %v1380_v56 }
0x189c   :  { %v1904_v59 = vpop.eup %1903 }
0x189d   :  { %v1383_v60 = vmul.f32 %v1904_v59, %v1372_v57  ;;  %v1395_v61 = vmul.f32 %v1904_v59, %v1393_v58  ;;  %v1386_v1 = vsub.f32 1.0, %v1904_v59 }
0x189f   :  { %v1384_v62 = vadd.f32 %v1383_v60, %v2310_v49 }
0x18a1   :  { %1905 = vtanh.f32 %v1384_v62 }
0x18ab   :  { %v1906_v24 = vpop.eup %1905 }
0x18ac   :  { %1388 = vrot.lane.b32.xlu0 %v1906_v24, %s2028_s3 }
0x191e   :  { %v1389_v3 = vpop.permute.xlu0 %1388 }
0x191f   :  { %v1391_v7 = vmul.f32 %v1389_v3, %v1386_v1 }
0x1921   :  { %v1396_v4 = vadd.f32 %v1395_v61, %v1391_v7 }
0x1923   :  { %1907 = vtanh.f32 %v1396_v4 }
0x192d   :  { %v1908_v9 = vpop.eup %1907 }
0x192e   :  { %v1398_v11 = vpack.c.bf16 %v1908_v9, %v1908_v9  ;;  %v1469_v32 = vrot.slane %v1908_v9, 6 }
0x1930   :  { %1400 = vrot.lane.b32.xlu1 %v1398_v11, %s2028_s3 }
0x1934   :  { %1483 = vrot.lane.b32.xlu1 %v1479_v41, %s2028_s3  ;;  %v106_v41 = vld [vmem:[#allocation7 + $0x3] ss:$0 sm:$0xff] }
0x19a2   :  { %v1401_v6 = vpop.permute.xlu1 %1400 }
0x19a3   :  { %1664 = vmatmul.mubr.msk.bf16.vlgmr.msra.gmra.mrb[28].mxu0 %vm171_vm0, %v1401_v6 }
0x19a6   :  { %v1484_v8 = vpop.permute.xlu1 %1483 }
0x19a7   :  { %1694 = vmatprep.mubr.msk.f32.mxu1 %vm171_vm0, %v1484_v8 }
0x1a76   :  { %v1439_v13 = vpop.f32.mrb[28].mxu0 }
0x1a77   :  { %v1440_v10 = vadd.f32 %v1439_v13, %v2323_v52  ;;  %v1441_v12 = vpop.f32.mrb[29].mxu0 }
0x1a78   :  { %v1443_v14 = vpop.f32.mrb[30].mxu0  ;;  %v1442_v25 = vadd.f32 %v1441_v12, %v2330_v63  ;;  %v1705_v63 = vpack.c.bf16 %v112_v2, %v111_v22 }
0x1a79   :  { %v1447_v38 = vrot.slane %v1440_v10, 6  ;;  %v1444_v15 = vpop.f32.mrb[31].mxu0 }
0x1a7a   :  { %v1457_v26 = vrot.slane %v1442_v25, 6 }
0x1a7b   :  { %v1449_v18 = vadd.f32 %v1447_v38, %v2308_v47  ;;  %v1697_v47 = vpack.c.bf16 %v108_v19, %v107_v0 }
0x1a7d   :  { %v1665_v40 = vmul.f32 -1.442695, %v1449_v18  ;;  %1698 = vmatprep.subr.bf16.mxu1 %v1697_v47 }
0x1a7e   :  { %1700 = vmatpush3.bf16.msra.mxu1 %v1697_v47 }
0x1a7f   :  { %1909 = vpow2.f32 %v1665_v40  ;;  %1702 = vmatprep.subr.bf16.mxu1 %v1701_v21 }
0x1a82   :  { %1704 = vmatpush3.bf16.msra.mxu1 %v1701_v21 }
0x1a83   :  { %1706 = vmatprep.subr.bf16.mxu1 %v1705_v63 }
0x1a86   :  { %1708 = vmatpush3.bf16.msra.mxu1 %v1705_v63 }
0x1a89   :  { %v1910_v23 = vpop.eup %1909 }
0x1a8a   :  { %v1453_v31 = vadd.f32 1.0, %v1910_v23 }
0x1a8c   :  { %1911 = vrcp.f32 %v1453_v31 }
0x1a96   :  { %v1912_v27 = vpop.eup %1911 }
0x1a97   :  { %v1459_v17 = vmul.f32 %v1912_v27, %v1457_v26  ;;  %v1462_v30 = vsub.f32 1.0, %v1912_v27  ;;  %v1471_v16 = vmul.f32 %v1912_v27, %v1469_v32 }
0x1a99   :  { %v1460_v28 = vadd.f32 %v1459_v17, %v2310_v49  ;;  %v1709_v49 = vpack.c.bf16 %v114_v33, %v113_v42 }
0x1a9b   :  { %1913 = vtanh.f32 %v1460_v28  ;;  %1710 = vmatprep.subr.bf16.mxu1 %v1709_v49 }
0x1a9c   :  { %1712 = vmatpush3.bf16.msra.mxu1 %v1709_v49 }
0x1aa5   :  { %v1914_v52 = vpop.eup %1913 }
0x1aa6   :  { %1464 = vrot.lane.b32.xlu0 %v1914_v52, %s2028_s3 }
0x1b18   :  { %v1465_v34 = vpop.permute.xlu0 %1464 }
0x1b19   :  { %v1467_v54 = vmul.f32 %v1465_v34, %v1462_v30 }
0x1b1b   :  { %v1472_v35 = vadd.f32 %v1471_v16, %v1467_v54 }
0x1b1d   :  { %1915 = vtanh.f32 %v1472_v35 }
0x1b27   :  { %v1916_v36 = vpop.eup %1915 }
0x1b28   :  { %v1480_v37 = vsel %vm1474_vm2, %v1908_v9, %v1916_v36 }
0x1b29   :  { %1485 = vrot.lane.b32.xlu0 %v1480_v37, %s2028_s3 }
0x1b9b   :  { %v1486_v39 = vpop.permute.xlu0 %1485 }
0x1b9c   :  { %1695 = vmatmul.mubr.msk.f32.vlgmr.msra.gmra.mrb[32].mxu1 %vm171_vm0, %v1486_v39 }
0x1c6f   :  { %v1696_v43 = vpop.f32.mrb[32].mxu1 }
0x1c70   :  { %v1563_v44 = vadd.f32 %v1696_v43, %v106_v41  ;;  %v1557_v5 = vpop.f32.mrb[33].mxu1 }
0x1c71   :  { %v1558_v45 = vadd.f32 %v1557_v5, %v106_v41 }
0x1c72   :  { %v1571_v46 = vsel %vm1570_vm5, %v1563_v44, -inf }
0x1c73   :  { %1572 = vmax.xlane.f32.xlu0 %v1571_v46  ;;  %v1567_v48 = vsel %vm1566_vm6, %v1558_v45, -inf }
0x1c74   :  { %1568 = vmax.xlane.f32.xlu1 %v1567_v48 }
0x1d00   :  { %v1573_v50 = vpop.xlane.xlu0 %1572 }
0x1d01   :  { %v1575_v51 = vsub.f32 %v1563_v44, %v1573_v50  ;;  %v1569_v53 = vpop.xlane.xlu1 %1568 }
0x1d02   :  { %v1574_v55 = vsub.f32 %v1558_v45, %v1569_v53 }
0x1d03   :  { %v1578_v56 = vmul.f32 1.442695, %v1575_v51 }
0x1d04   :  { %v1576_v57 = vmul.f32 1.442695, %v1574_v55 }
0x1d05   :  { %1917 = vpow2.f32 %v1578_v56 }
0x1d06   :  { %1919 = vpow2.f32 %v1576_v57 }
0x1d0f   :  { %v1918_v58 = vpop.eup %1917 }
0x1d10   :  { %v1920_v59 = vpop.eup %1919  ;;  %v1583_v60 = vsel %vm1570_vm5, %v1918_v58, 0.0 }
0x1d11   :  { %1584 = vadd.xlane.f32.xlu1 %v1583_v60  ;;  %v1580_v61 = vsel %vm1566_vm6, %v1920_v59, 0.0 }
0x1d12   :  { %1581 = vadd.xlane.f32.xlu0 %v1580_v61 }
0x1d9e   :  { %v1585_v62 = vpop.xlane.xlu1 %1584 }
0x1d9f   :  { %1921 = vlog2.f32 %v1585_v62  ;;  %v1582_v24 = vpop.xlane.xlu0 %1581 }
0x1da0   :  { %1923 = vlog2.f32 %v1582_v24 }
0x1da9   :  { %v1922_v1 = vpop.eup %1921 }
0x1daa   :  { %v1924_v3 = vpop.eup %1923  ;;  %v1589_v7 = vmul.f32 0.6931472, %v1922_v1 }
0x1dab   :  { %v1587_v4 = vmul.f32 0.6931472, %v1924_v3 }
0x1dac   :  { %v1591_v9 = vsub.f32 %v1575_v51, %v1589_v7 }
0x1dad   :  { %v1590_v11 = vsub.f32 %v1574_v55, %v1587_v4 }
0x1dae   :  { %1593 = vst.msk [vmem:[%s2425_s4 + $0x8] sm:$0xf] %vm1570_vm5, %v1591_v9 }
0x1daf   :  { %1592 = vst.msk [vmem:[%s2425_s4] sm:$0xff] %vm1566_vm6, %v1590_v11 }
0x1db0   :  { %1598 = vsyncpa [#allocation3], 1 }
0x1db1   :  { %1599 = vsyncpa [#allocation5], 1 }
0x1db2   :  { %1600 = vsyncpa [#allocation8], 1 }

</bundles_post_ra>
